<compile_context>
chip_gen: v7x
topology: tpu7x:2x2x1
jax: 0.10.0
libtpu: 0.0.40
codegen_flags: <defaults>
</compile_context>

<pallas_src>
import jax
import jax.numpy as jnp
from jax.experimental import pallas as pl
from jax.experimental.pallas import tpu as pltpu


def _mish_f32(x):
    # mish(x) = x * tanh(softplus(x)) = x * t / (t + 2),  t = e^x * (e^x + 2)
    # One exp (EUP) + one approx reciprocal (EUP).  Clamp: for x >= 20 in f32,
    # t/(t+2) == 1 so mish(x) == x, and exp(20)^2 ~ 2.4e17 cannot overflow.
    e = jnp.exp(jnp.minimum(x, 20.0))
    t = e * (e + 2.0)
    return x * t * pl.reciprocal(t + 2.0, approx=True)


def _mish_any(x):
    # Dtype-preserving mish, used in bf16 on the hidden activations so the
    # VPU/EUP work runs at double lane density on v6e/v7x (Mosaic upcasts on
    # v5e).  pl.reciprocal(approx=True) is f32-only, so use a plain divide.
    e = jnp.exp(jnp.minimum(x, 20.0))
    t = e * (e + 2.0)
    return x * (t / (t + 2.0))


def residual_mlp_kernel(x_ref, gamma_ref, beta_ref, w1_ref, b1_ref, w2_ref,
                        b2_ref, o_ref, xn_ref, acc_ref):
    h_idx = pl.program_id(1)
    inv_d = 1.0 / x_ref.shape[-1]

    @pl.when(h_idx == 0)
    def _():
        # LayerNorm with single-pass statistics: sum and sum-of-squares are
        # independent lane reductions (no serial mean -> center -> var chain).
        x = x_ref[...].astype(jnp.float32)
        s1 = jnp.sum(x, axis=-1, keepdims=True)
        s2 = jnp.sum(x * x, axis=-1, keepdims=True)
        mean = s1 * inv_d
        var = jnp.maximum(s2 * inv_d - mean * mean, 0.0)
        xn = (x - mean) * jax.lax.rsqrt(var + 1e-5) * gamma_ref[...] + beta_ref[...]
        xn_ref[...] = xn.astype(jnp.bfloat16)
        acc_ref[...] = jnp.zeros_like(acc_ref)

    # Linear1 (bf16 x bf16 -> f32 MXU accumulation) + f32 bias + bf16 mish.
    h = jnp.dot(xn_ref[...], w1_ref[...], preferred_element_type=jnp.float32)
    h = _mish_any((h + b1_ref[...]).astype(jnp.bfloat16))
    # Linear2 partial product, accumulated in f32 over the hidden tiles.
    acc_ref[...] += jnp.dot(h, w2_ref[...], preferred_element_type=jnp.float32)

    @pl.when(h_idx == pl.num_programs(1) - 1)
    def _():
        # Dropout is identity in eval/inference mode.
        # TODO(synk): training-mode dropout (p=0.25) would need pltpu.prng_seed
        #             + pltpu.prng_random_bits mask and a 1/(1-p) rescale.
        y = acc_ref[...] + b2_ref[...]
        # Re-read the residual from the resident x tile instead of holding an
        # f32 copy live across both matmuls (cuts vreg pressure at large bm).
        residual = x_ref[...].astype(jnp.float32)
        o_ref[...] = _mish_f32(y + residual).astype(o_ref.dtype)


def _tpu_params():
    """(physical VMEM bytes, TensorCores per chip) with conservative defaults."""
    vmem = 64 << 20   # v7x-sized default (smallest current VMEM)
    cores = 2         # assume dual-TC so we keep >= 2 grid steps per core
    try:
        info = pltpu.get_tpu_info()
        vmem = int(getattr(info, "vmem_capacity_bytes", vmem))
        for name in ("num_cores", "core_count", "num_tensorcores",
                     "tensorcore_count", "cores_per_chip"):
            val = getattr(info, name, None)
            if isinstance(val, int) and val > 0:
                cores = val
                break
    except Exception:
        pass
    vmem = min(max(vmem, 32 << 20), 256 << 20)
    return vmem, cores


def _vmem_bytes(bm, D, H, th, single_buf_w):
    """Rough resident-VMEM estimate for one grid step."""
    f32, bf16 = 4, 2
    wbuf = 1 if single_buf_w else 2
    io = 2 * 2 * bm * D * f32                 # x tile + out tile, double-buffered
    wts = wbuf * 2 * D * th * bf16            # w1 tile + w2 tile (bf16)
    vecs = 3 * D * f32 + wbuf * th * f32      # gamma, beta, b2 + b1 tile
    scratch = bm * D * (bf16 + f32)           # xn (bf16) + f32 accumulator
    live = 4 * bm * max(D, th) * f32          # in-kernel live intermediates (slack)
    return io + wts + vecs + scratch + live


_BM_CANDIDATES = (1024, 512, 256, 128, 64, 32, 16, 8)
_TH_CANDIDATES = (4096, 2048, 1024, 512, 256, 128)


def _pick_tiles(B, D, H, budget, cores):
    # Hidden tile: keep the full (D,H)/(H,D) bf16 weights resident and
    # single-buffered while they fit in ~half the budget; otherwise tile H
    # (inner "arbitrary" grid axis) with default double-buffering so the next
    # weight tile DMA overlaps compute.
    if 2 * D * H * 2 <= budget // 2:
        th, single_buf_w = H, True
    else:
        th, single_buf_w = H, False
        for cand in _TH_CANDIDATES:
            if cand < H and H % cand == 0 and 8 * D * cand <= budget // 2:
                th = cand
                break
        # TODO(synk): if H has no suitable multiple-of-128 divisor we fall back
        #             to the full (possibly tight) weight block.

    if B < 8:
        return B, th, single_buf_w   # full-array batch block (always legal)

    # Batch tile: largest multiple of 8 dividing B that fits the budget while
    # leaving >= 2 grid steps per TensorCore so DMA overlaps compute.
    cap = B if B < 8 * 2 * cores else B // (2 * cores)
    for bm in _BM_CANDIDATES:
        if bm <= cap and B % bm == 0 and _vmem_bytes(bm, D, H, th, single_buf_w) <= budget:
            return bm, th, single_buf_w
    # No divisor fits: pick the largest budget-fitting tile; the grid becomes
    # ragged (pl.cdiv); Pallas masks the out-of-bounds rows of the last block
    # and every row here is computed independently, so this is safe.
    for bm in _BM_CANDIDATES:
        if bm <= max(cap, 8) and _vmem_bytes(bm, D, H, th, single_buf_w) <= budget:
            return bm, th, single_buf_w
    return 8, th, single_buf_w


def residual_mlp_block(x, gamma, beta, w1, b1, w2, b2, *, bm=None, th=None):
    B, D = x.shape
    H = w1.shape[1]

    vmem_cap, num_cores = _tpu_params()
    budget = (vmem_cap * 5) // 8          # ~40 MiB on v7x, ~80 MiB on v5e/v6e
    limit_cap = (vmem_cap * 25) // 32     # ~50 MiB / ~100 MiB ceiling

    auto_bm, auto_th, single_buf_w = _pick_tiles(B, D, H, budget, num_cores)
    if bm is None:
        bm = auto_bm
    if th is None:
        th = auto_th
    else:
        single_buf_w = (th == H) and (2 * D * H * 2 <= budget // 2)
    assert H % th == 0, f"hidden dim {H} must be divisible by tile {th}"

    # Matmul operands in bf16 (f32 MXU accumulation in-kernel); LayerNorm
    # statistics, biases and the residual path stay f32.
    w1 = w1.astype(jnp.bfloat16)
    w2 = w2.astype(jnp.bfloat16)
    gamma = gamma.reshape(1, D).astype(jnp.float32)
    beta = beta.reshape(1, D).astype(jnp.float32)
    b1 = b1.reshape(1, H).astype(jnp.float32)
    b2 = b2.reshape(1, D).astype(jnp.float32)

    grid = (pl.cdiv(B, bm), H // th)
    est = _vmem_bytes(bm, D, H, th, single_buf_w)
    vmem_limit = int(min(max(2 * est, 16 << 20), limit_cap))

    out_bytes = jnp.dtype(x.dtype).itemsize
    cost = pl.CostEstimate(
        flops=int(4 * B * D * H),
        transcendentals=int(2 * B * (H + D)),
        bytes_accessed=int(B * D * (4 + out_bytes) + 2 * D * H * 2
                           + (3 * D + H) * 4),
    )

    def build(single_buffer_consts):
        def spec(shape, index_map, const):
            if const and single_buffer_consts and hasattr(pl, "Buffered"):
                # Constant-index_map operand: double-buffering buys nothing,
                # single-buffering halves its resident VMEM footprint.
                return pl.BlockSpec(shape, index_map,
                                    pipeline_mode=pl.Buffered(1))
            return pl.BlockSpec(shape, index_map)

        w_const = single_buf_w   # weights have a constant index only when th == H
        in_specs = [
            spec((bm, D), lambda i, h: (i, 0), False),    # x tile
            spec((1, D), lambda i, h: (0, 0), True),      # gamma
            spec((1, D), lambda i, h: (0, 0), True),      # beta
            spec((D, th), lambda i, h: (0, h), w_const),  # w1 tile (in, hidden)
            spec((1, th), lambda i, h: (0, h), w_const),  # b1 tile
            spec((th, D), lambda i, h: (h, 0), w_const),  # w2 tile (hidden, in)
            spec((1, D), lambda i, h: (0, 0), True),      # b2
        ]
        return pl.pallas_call(
            residual_mlp_kernel,
            out_shape=jax.ShapeDtypeStruct((B, D), x.dtype),
            grid_spec=pltpu.PrefetchScalarGridSpec(
                num_scalar_prefetch=0,
                grid=grid,
                in_specs=in_specs,
                out_specs=pl.BlockSpec((bm, D), lambda i, h: (i, 0)),
                scratch_shapes=[
                    pltpu.VMEM((bm, D), jnp.bfloat16),   # normalized x (matmul1 LHS)
                    pltpu.VMEM((bm, D), jnp.float32),    # matmul2 f32 accumulator
                ],
            ),
            compiler_params=pltpu.CompilerParams(
                dimension_semantics=("parallel", "arbitrary"),
                vmem_limit_bytes=vmem_limit,
            ),
            cost_estimate=cost,
        )

    args = (x, gamma, beta, w1, b1, w2, b2)
    try:
        return build(True)(*args)
    except Exception:
        # Fallback for jax versions without BlockSpec pipeline_mode support
        # (or any single-buffering lowering issue): plain double-buffered specs.
        return build(False)(*args)


def _reference(x, gamma, beta, w1, b1, w2, b2):
    def mish(v):
        return v * jnp.tanh(jax.nn.softplus(v))
    mean = jnp.mean(x, axis=-1, keepdims=True)
    var = jnp.mean((x - mean) ** 2, axis=-1, keepdims=True)
    xn = (x - mean) * jax.lax.rsqrt(var + 1e-5) * gamma + beta
    h = mish(xn @ w1 + b1)
    y = h @ w2 + b2
    return mish(y + x)


if __name__ == "__main__":
    key = jax.random.PRNGKey(0)
    # Small but lane/MXU-friendly shapes: feature dims are multiples of 128 so
    # the output store is lane-dense and both matmul N dims fill MXU columns.
    B, D, H = 256, 128, 256

    k = jax.random.split(key, 7)
    x = jax.random.normal(k[0], (B, D), dtype=jnp.float32)
    gamma = 1.0 + 0.1 * jax.random.normal(k[1], (1, D), dtype=jnp.float32)
    beta = 0.05 * jax.random.normal(k[2], (1, D), dtype=jnp.float32)
    # PyTorch Linear weight is (out, in); the kernel uses the (in, out) layout.
    w1 = jax.random.normal(k[3], (D, H), dtype=jnp.float32) * (1.0 / jnp.sqrt(D))
    b1 = jax.random.normal(k[4], (1, H), dtype=jnp.float32) * 0.01
    w2 = jax.random.normal(k[5], (H, D), dtype=jnp.float32) * (1.0 / jnp.sqrt(H))
    b2 = jax.random.normal(k[6], (1, D), dtype=jnp.float32) * 0.01

    out = residual_mlp_block(x, gamma, beta, w1, b1, w2, b2)
    out = jax.block_until_ready(out)

    ref = _reference(x, gamma, beta, w1, b1, w2, b2)
    # bf16 matmul operands + bf16 hidden mish + approx-reciprocal final mish:
    # compare against the pure-f32 reference with a correspondingly looser tol.
    max_err = jnp.max(jnp.abs(out - ref))
    assert jnp.allclose(out, ref, atol=5e-2, rtol=5e-2), (
        f"mismatch vs reference; max abs err = {max_err}")

    print("KERNEL_OK")
</pallas_src>

<mosaic_0001>
module attributes {stable_mosaic.version = 11 : i64} {
  func.func @residual_mlp_kernel(%arg0: i32, %arg1: i32, %arg2: memref<64x128xf32, #tpu.memory_space<vmem>>, %arg3: memref<1x128xf32, #tpu.memory_space<vmem>>, %arg4: memref<1x128xf32, #tpu.memory_space<vmem>>, %arg5: memref<128x256xbf16, #tpu.memory_space<vmem>>, %arg6: memref<1x256xf32, #tpu.memory_space<vmem>>, %arg7: memref<256x128xbf16, #tpu.memory_space<vmem>>, %arg8: memref<1x128xf32, #tpu.memory_space<vmem>>, %arg9: memref<64x128xf32, #tpu.memory_space<vmem>>, %arg10: memref<64x128xbf16, #tpu.memory_space<vmem>>, %arg11: memref<64x128xf32, #tpu.memory_space<vmem>>) attributes {dimension_semantics = [#tpu.dimension_semantics<parallel>, #tpu.dimension_semantics<arbitrary>], iteration_bounds = array<i64: 4, 1>, scalar_prefetch = 0 : i64, scratch_operands = 2 : i64, tpu.core_type = #tpu.core_type<tc>, window_params = [{transform_indices = @transform_0, window_bounds = array<i64: 64, 128>}, {pipeline_mode = #tpu.pipeline_mode<synchronous>, transform_indices = @transform_1, window_bounds = array<i64: 1, 128>}, {pipeline_mode = #tpu.pipeline_mode<synchronous>, transform_indices = @transform_2, window_bounds = array<i64: 1, 128>}, {pipeline_mode = #tpu.pipeline_mode<synchronous>, transform_indices = @transform_3, window_bounds = array<i64: 128, 256>}, {pipeline_mode = #tpu.pipeline_mode<synchronous>, transform_indices = @transform_4, window_bounds = array<i64: 1, 256>}, {pipeline_mode = #tpu.pipeline_mode<synchronous>, transform_indices = @transform_5, window_bounds = array<i64: 256, 128>}, {pipeline_mode = #tpu.pipeline_mode<synchronous>, transform_indices = @transform_6, window_bounds = array<i64: 1, 128>}, {transform_indices = @transform_7, window_bounds = array<i64: 64, 128>}]} {
    %c0_i32 = arith.constant 0 : i32
    %0 = arith.cmpi eq, %arg1, %c0_i32 : i32
    %1 = arith.extui %0 : i1 to i32
    %c0_i32_0 = arith.constant 0 : i32
    %2 = arith.cmpi ne, %1, %c0_i32_0 : i32
    scf.if %2 {
      %c0_18 = arith.constant 0 : index
      %c0_19 = arith.constant 0 : index
      %28 = vector.load %arg2[%c0_18, %c0_19] : memref<64x128xf32, #tpu.memory_space<vmem>>, vector<64x128xf32>
      %cst_20 = arith.constant dense<0.000000e+00> : vector<64xf32>
      %29 = vector.multi_reduction <add>, %28, %cst_20 [1] : vector<64x128xf32> to vector<64xf32>
      %30 = vector.shape_cast %29 : vector<64xf32> to vector<64x1xf32>
      %31 = arith.mulf %28, %28 : vector<64x128xf32>
      %cst_21 = arith.constant dense<0.000000e+00> : vector<64xf32>
      %32 = vector.multi_reduction <add>, %31, %cst_21 [1] : vector<64x128xf32> to vector<64xf32>
      %33 = vector.shape_cast %32 : vector<64xf32> to vector<64x1xf32>
      %cst_22 = arith.constant 7.812500e-03 : f32
      %34 = vector.broadcast %cst_22 : f32 to vector<64x1xf32>
      %35 = arith.mulf %30, %34 : vector<64x1xf32>
      %cst_23 = arith.constant 7.812500e-03 : f32
      %36 = vector.broadcast %cst_23 : f32 to vector<64x1xf32>
      %37 = arith.mulf %33, %36 : vector<64x1xf32>
      %38 = arith.mulf %35, %35 : vector<64x1xf32>
      %39 = arith.subf %37, %38 : vector<64x1xf32>
      %cst_24 = arith.constant 0.000000e+00 : f32
      %40 = vector.broadcast %cst_24 : f32 to vector<64x1xf32>
      %41 = arith.maximumf %39, %40 : vector<64x1xf32>
      %42 = vector.broadcast %35 : vector<64x1xf32> to vector<64x128xf32>
      %43 = arith.subf %28, %42 : vector<64x128xf32>
      %cst_25 = arith.constant 9.99999974E-6 : f32
      %44 = vector.broadcast %cst_25 : f32 to vector<64x1xf32>
      %45 = arith.addf %41, %44 : vector<64x1xf32>
      %46 = math.rsqrt %45 : vector<64x1xf32>
      %47 = vector.broadcast %46 : vector<64x1xf32> to vector<64x128xf32>
      %48 = arith.mulf %43, %47 : vector<64x128xf32>
      %c0_26 = arith.constant 0 : index
      %c0_27 = arith.constant 0 : index
      %49 = vector.load %arg3[%c0_26, %c0_27] : memref<1x128xf32, #tpu.memory_space<vmem>>, vector<1x128xf32>
      %50 = vector.broadcast %49 : vector<1x128xf32> to vector<64x128xf32>
      %51 = arith.mulf %48, %50 : vector<64x128xf32>
      %c0_28 = arith.constant 0 : index
      %c0_29 = arith.constant 0 : index
      %52 = vector.load %arg4[%c0_28, %c0_29] : memref<1x128xf32, #tpu.memory_space<vmem>>, vector<1x128xf32>
      %53 = vector.broadcast %52 : vector<1x128xf32> to vector<64x128xf32>
      %54 = arith.addf %51, %53 : vector<64x128xf32>
      %55 = arith.truncf %54 : vector<64x128xf32> to vector<64x128xbf16>
      %c0_30 = arith.constant 0 : index
      %c0_31 = arith.constant 0 : index
      %56 = vector.load %arg10[%c0_30, %c0_31] : memref<64x128xbf16, #tpu.memory_space<vmem>>, vector<64x128xbf16>
      tpu.vector_store %arg10[%c0_30, %c0_31], %55 {strides = array<i32>} : memref<64x128xbf16, #tpu.memory_space<vmem>>, vector<64x128xbf16>,
      %cst_32 = arith.constant 0.000000e+00 : f32
      %57 = vector.broadcast %cst_32 : f32 to vector<64x128xf32>
      %c0_33 = arith.constant 0 : index
      %c0_34 = arith.constant 0 : index
      %58 = vector.load %arg11[%c0_33, %c0_34] : memref<64x128xf32, #tpu.memory_space<vmem>>, vector<64x128xf32>
      tpu.vector_store %arg11[%c0_33, %c0_34], %57 {strides = array<i32>} : memref<64x128xf32, #tpu.memory_space<vmem>>, vector<64x128xf32>,
    } else {
    }
    %c0 = arith.constant 0 : index
    %c0_1 = arith.constant 0 : index
    %3 = vector.load %arg10[%c0, %c0_1] : memref<64x128xbf16, #tpu.memory_space<vmem>>, vector<64x128xbf16>
    %c0_2 = arith.constant 0 : index
    %c0_3 = arith.constant 0 : index
    %4 = vector.load %arg5[%c0_2, %c0_3] : memref<128x256xbf16, #tpu.memory_space<vmem>>, vector<128x256xbf16>
    %cst = arith.constant dense<0.000000e+00> : vector<64x256xf32>
    %5 = tpu.matmul %3, %4, %cst {dimension_numbers = #tpu.dot_dimension_numbers<[1], [0], [0], [1], [0, 0, 1, 1], [], []>} : vector<64x128xbf16>, vector<128x256xbf16>, vector<64x256xf32> -> vector<64x256xf32>
    %c0_4 = arith.constant 0 : index
    %c0_5 = arith.constant 0 : index
    %6 = vector.load %arg6[%c0_4, %c0_5] : memref<1x256xf32, #tpu.memory_space<vmem>>, vector<1x256xf32>
    %7 = vector.broadcast %6 : vector<1x256xf32> to vector<64x256xf32>
    %8 = arith.addf %5, %7 : vector<64x256xf32>
    %9 = arith.truncf %8 : vector<64x256xf32> to vector<64x256xbf16>
    %cst_6 = arith.constant 2.000000e+01 : bf16
    %10 = vector.broadcast %cst_6 : bf16 to vector<64x256xbf16>
    %11 = arith.minimumf %9, %10 : vector<64x256xbf16>
    %12 = math.exp %11 : vector<64x256xbf16>
    %cst_7 = arith.constant 2.000000e+00 : bf16
    %13 = vector.broadcast %cst_7 : bf16 to vector<64x256xbf16>
    %14 = arith.addf %12, %13 : vector<64x256xbf16>
    %15 = arith.mulf %12, %14 : vector<64x256xbf16>
    %cst_8 = arith.constant 2.000000e+00 : bf16
    %16 = vector.broadcast %cst_8 : bf16 to vector<64x256xbf16>
    %17 = arith.addf %15, %16 : vector<64x256xbf16>
    %18 = arith.divf %15, %17 : vector<64x256xbf16>
    %19 = arith.mulf %9, %18 : vector<64x256xbf16>
    %c0_9 = arith.constant 0 : index
    %c0_10 = arith.constant 0 : index
    %20 = vector.load %arg11[%c0_9, %c0_10] : memref<64x128xf32, #tpu.memory_space<vmem>>, vector<64x128xf32>
    %c0_11 = arith.constant 0 : index
    %c0_12 = arith.constant 0 : index
    %21 = vector.load %arg7[%c0_11, %c0_12] : memref<256x128xbf16, #tpu.memory_space<vmem>>, vector<256x128xbf16>
    %cst_13 = arith.constant dense<0.000000e+00> : vector<64x128xf32>
    %22 = tpu.matmul %19, %21, %cst_13 {dimension_numbers = #tpu.dot_dimension_numbers<[1], [0], [0], [1], [0, 0, 1, 1], [], []>} : vector<64x256xbf16>, vector<256x128xbf16>, vector<64x128xf32> -> vector<64x128xf32>
    %23 = arith.addf %20, %22 : vector<64x128xf32>
    %c0_14 = arith.constant 0 : index
    %c0_15 = arith.constant 0 : index
    %24 = vector.load %arg11[%c0_14, %c0_15] : memref<64x128xf32, #tpu.memory_space<vmem>>, vector<64x128xf32>
    tpu.vector_store %arg11[%c0_14, %c0_15], %23 {strides = array<i32>} : memref<64x128xf32, #tpu.memory_space<vmem>>, vector<64x128xf32>,
    %c0_i32_16 = arith.constant 0 : i32
    %25 = arith.cmpi eq, %arg1, %c0_i32_16 : i32
    %26 = arith.extui %25 : i1 to i32
    %c0_i32_17 = arith.constant 0 : i32
    %27 = arith.cmpi ne, %26, %c0_i32_17 : i32
    scf.if %27 {
      %c0_18 = arith.constant 0 : index
      %c0_19 = arith.constant 0 : index
      %28 = vector.load %arg11[%c0_18, %c0_19] : memref<64x128xf32, #tpu.memory_space<vmem>>, vector<64x128xf32>
      %c0_20 = arith.constant 0 : index
      %c0_21 = arith.constant 0 : index
      %29 = vector.load %arg8[%c0_20, %c0_21] : memref<1x128xf32, #tpu.memory_space<vmem>>, vector<1x128xf32>
      %30 = vector.broadcast %29 : vector<1x128xf32> to vector<64x128xf32>
      %31 = arith.addf %28, %30 : vector<64x128xf32>
      %c0_22 = arith.constant 0 : index
      %c0_23 = arith.constant 0 : index
      %32 = vector.load %arg2[%c0_22, %c0_23] : memref<64x128xf32, #tpu.memory_space<vmem>>, vector<64x128xf32>
      %33 = arith.addf %31, %32 : vector<64x128xf32>
      %cst_24 = arith.constant 2.000000e+01 : f32
      %34 = vector.broadcast %cst_24 : f32 to vector<64x128xf32>
      %35 = arith.minimumf %33, %34 : vector<64x128xf32>
      %36 = math.exp %35 : vector<64x128xf32>
      %cst_25 = arith.constant 2.000000e+00 : f32
      %37 = vector.broadcast %cst_25 : f32 to vector<64x128xf32>
      %38 = arith.addf %36, %37 : vector<64x128xf32>
      %39 = arith.mulf %36, %38 : vector<64x128xf32>
      %40 = arith.mulf %33, %39 : vector<64x128xf32>
      %cst_26 = arith.constant 2.000000e+00 : f32
      %41 = vector.broadcast %cst_26 : f32 to vector<64x128xf32>
      %42 = arith.addf %39, %41 : vector<64x128xf32>
      %43 = tpu.reciprocal %42 {approx = true} : vector<64x128xf32> -> vector<64x128xf32>
      %44 = arith.mulf %40, %43 : vector<64x128xf32>
      %c0_27 = arith.constant 0 : index
      %c0_28 = arith.constant 0 : index
      %45 = vector.load %arg9[%c0_27, %c0_28] : memref<64x128xf32, #tpu.memory_space<vmem>>, vector<64x128xf32>
      tpu.vector_store %arg9[%c0_27, %c0_28], %44 {strides = array<i32>} : memref<64x128xf32, #tpu.memory_space<vmem>>, vector<64x128xf32>,
    } else {
    }
    return
  }
  func.func @transform_0(%arg0: i32, %arg1: i32) -> (i32, i32) {
    %c0_i32 = arith.constant 0 : i32
    %c0_i32_0 = arith.constant 0 : i32
    return %arg0, %c0_i32 : i32, i32
  }
  func.func @transform_1(%arg0: i32, %arg1: i32) -> (i32, i32) {
    %c0_i32 = arith.constant 0 : i32
    %c0_i32_0 = arith.constant 0 : i32
    %c0_i32_1 = arith.constant 0 : i32
    return %c0_i32, %c0_i32_0 : i32, i32
  }
  func.func @transform_2(%arg0: i32, %arg1: i32) -> (i32, i32) {
    %c0_i32 = arith.constant 0 : i32
    %c0_i32_0 = arith.constant 0 : i32
    %c0_i32_1 = arith.constant 0 : i32
    return %c0_i32, %c0_i32_0 : i32, i32
  }
  func.func @transform_3(%arg0: i32, %arg1: i32) -> (i32, i32) {
    %c0_i32 = arith.constant 0 : i32
    %c0_i32_0 = arith.constant 0 : i32
    return %c0_i32, %arg1 : i32, i32
  }
  func.func @transform_4(%arg0: i32, %arg1: i32) -> (i32, i32) {
    %c0_i32 = arith.constant 0 : i32
    %c0_i32_0 = arith.constant 0 : i32
    return %c0_i32, %arg1 : i32, i32
  }
  func.func @transform_5(%arg0: i32, %arg1: i32) -> (i32, i32) {
    %c0_i32 = arith.constant 0 : i32
    %c0_i32_0 = arith.constant 0 : i32
    return %arg1, %c0_i32 : i32, i32
  }
  func.func @transform_6(%arg0: i32, %arg1: i32) -> (i32, i32) {
    %c0_i32 = arith.constant 0 : i32
    %c0_i32_0 = arith.constant 0 : i32
    %c0_i32_1 = arith.constant 0 : i32
    return %c0_i32, %c0_i32_0 : i32, i32
  }
  func.func @transform_7(%arg0: i32, %arg1: i32) -> (i32, i32) {
    %c0_i32 = arith.constant 0 : i32
    %c0_i32_0 = arith.constant 0 : i32
    return %arg0, %c0_i32 : i32, i32
  }
}

module attributes {stable_mosaic.version = 11 : i64} {
  func.func @residual_mlp_kernel(%arg0: i32, %arg1: i32, %arg2: memref<64x128xf32, #tpu.memory_space<vmem>>, %arg3: memref<1x128xf32, #tpu.memory_space<vmem>>, %arg4: memref<1x128xf32, #tpu.memory_space<vmem>>, %arg5: memref<128x256xbf16, #tpu.memory_space<vmem>>, %arg6: memref<1x256xf32, #tpu.memory_space<vmem>>, %arg7: memref<256x128xbf16, #tpu.memory_space<vmem>>, %arg8: memref<1x128xf32, #tpu.memory_space<vmem>>, %arg9: memref<64x128xf32, #tpu.memory_space<vmem>>, %arg10: memref<64x128xbf16, #tpu.memory_space<vmem>>, %arg11: memref<64x128xf32, #tpu.memory_space<vmem>>) attributes {dimension_semantics = [#tpu.dimension_semantics<parallel>, #tpu.dimension_semantics<arbitrary>], iteration_bounds = array<i64: 4, 1>, scalar_prefetch = 0 : i64, scratch_operands = 2 : i64, tpu.core_type = #tpu.core_type<tc>, window_params = [{transform_indices = @transform_0, window_bounds = array<i64: 64, 128>}, {pipeline_mode = #tpu.pipeline_mode<synchronous>, transform_indices = @transform_1, window_bounds = array<i64: 1, 128>}, {pipeline_mode = #tpu.pipeline_mode<synchronous>, transform_indices = @transform_2, window_bounds = array<i64: 1, 128>}, {transform_indices = @transform_3, window_bounds = array<i64: 128, 256>}, {transform_indices = @transform_4, window_bounds = array<i64: 1, 256>}, {transform_indices = @transform_5, window_bounds = array<i64: 256, 128>}, {pipeline_mode = #tpu.pipeline_mode<synchronous>, transform_indices = @transform_6, window_bounds = array<i64: 1, 128>}, {transform_indices = @transform_7, window_bounds = array<i64: 64, 128>}]} {
    %c0_i32 = arith.constant 0 : i32
    %0 = arith.cmpi eq, %arg1, %c0_i32 : i32
    %1 = arith.extui %0 : i1 to i32
    %c0_i32_0 = arith.constant 0 : i32
    %2 = arith.cmpi ne, %1, %c0_i32_0 : i32
    scf.if %2 {
      %c0_18 = arith.constant 0 : index
      %c0_19 = arith.constant 0 : index
      %28 = vector.load %arg2[%c0_18, %c0_19] : memref<64x128xf32, #tpu.memory_space<vmem>>, vector<64x128xf32>
      %cst_20 = arith.constant dense<0.000000e+00> : vector<64xf32>
      %29 = vector.multi_reduction <add>, %28, %cst_20 [1] : vector<64x128xf32> to vector<64xf32>
      %30 = vector.shape_cast %29 : vector<64xf32> to vector<64x1xf32>
      %31 = arith.mulf %28, %28 : vector<64x128xf32>
      %cst_21 = arith.constant dense<0.000000e+00> : vector<64xf32>
      %32 = vector.multi_reduction <add>, %31, %cst_21 [1] : vector<64x128xf32> to vector<64xf32>
      %33 = vector.shape_cast %32 : vector<64xf32> to vector<64x1xf32>
      %cst_22 = arith.constant 7.812500e-03 : f32
      %34 = vector.broadcast %cst_22 : f32 to vector<64x1xf32>
      %35 = arith.mulf %30, %34 : vector<64x1xf32>
      %cst_23 = arith.constant 7.812500e-03 : f32
      %36 = vector.broadcast %cst_23 : f32 to vector<64x1xf32>
      %37 = arith.mulf %33, %36 : vector<64x1xf32>
      %38 = arith.mulf %35, %35 : vector<64x1xf32>
      %39 = arith.subf %37, %38 : vector<64x1xf32>
      %cst_24 = arith.constant 0.000000e+00 : f32
      %40 = vector.broadcast %cst_24 : f32 to vector<64x1xf32>
      %41 = arith.maximumf %39, %40 : vector<64x1xf32>
      %42 = vector.broadcast %35 : vector<64x1xf32> to vector<64x128xf32>
      %43 = arith.subf %28, %42 : vector<64x128xf32>
      %cst_25 = arith.constant 9.99999974E-6 : f32
      %44 = vector.broadcast %cst_25 : f32 to vector<64x1xf32>
      %45 = arith.addf %41, %44 : vector<64x1xf32>
      %46 = math.rsqrt %45 : vector<64x1xf32>
      %47 = vector.broadcast %46 : vector<64x1xf32> to vector<64x128xf32>
      %48 = arith.mulf %43, %47 : vector<64x128xf32>
      %c0_26 = arith.constant 0 : index
      %c0_27 = arith.constant 0 : index
      %49 = vector.load %arg3[%c0_26, %c0_27] : memref<1x128xf32, #tpu.memory_space<vmem>>, vector<1x128xf32>
      %50 = vector.broadcast %49 : vector<1x128xf32> to vector<64x128xf32>
      %51 = arith.mulf %48, %50 : vector<64x128xf32>
      %c0_28 = arith.constant 0 : index
      %c0_29 = arith.constant 0 : index
      %52 = vector.load %arg4[%c0_28, %c0_29] : memref<1x128xf32, #tpu.memory_space<vmem>>, vector<1x128xf32>
      %53 = vector.broadcast %52 : vector<1x128xf32> to vector<64x128xf32>
      %54 = arith.addf %51, %53 : vector<64x128xf32>
      %55 = arith.truncf %54 : vector<64x128xf32> to vector<64x128xbf16>
      %c0_30 = arith.constant 0 : index
      %c0_31 = arith.constant 0 : index
      %56 = vector.load %arg10[%c0_30, %c0_31] : memref<64x128xbf16, #tpu.memory_space<vmem>>, vector<64x128xbf16>
      tpu.vector_store %arg10[%c0_30, %c0_31], %55 {strides = array<i32>} : memref<64x128xbf16, #tpu.memory_space<vmem>>, vector<64x128xbf16>,
      %cst_32 = arith.constant 0.000000e+00 : f32
      %57 = vector.broadcast %cst_32 : f32 to vector<64x128xf32>
      %c0_33 = arith.constant 0 : index
      %c0_34 = arith.constant 0 : index
      %58 = vector.load %arg11[%c0_33, %c0_34] : memref<64x128xf32, #tpu.memory_space<vmem>>, vector<64x128xf32>
      tpu.vector_store %arg11[%c0_33, %c0_34], %57 {strides = array<i32>} : memref<64x128xf32, #tpu.memory_space<vmem>>, vector<64x128xf32>,
    } else {
    }
    %c0 = arith.constant 0 : index
    %c0_1 = arith.constant 0 : index
    %3 = vector.load %arg10[%c0, %c0_1] : memref<64x128xbf16, #tpu.memory_space<vmem>>, vector<64x128xbf16>
    %c0_2 = arith.constant 0 : index
    %c0_3 = arith.constant 0 : index
    %4 = vector.load %arg5[%c0_2, %c0_3] : memref<128x256xbf16, #tpu.memory_space<vmem>>, vector<128x256xbf16>
    %cst = arith.constant dense<0.000000e+00> : vector<64x256xf32>
    %5 = tpu.matmul %3, %4, %cst {dimension_numbers = #tpu.dot_dimension_numbers<[1], [0], [0], [1], [0, 0, 1, 1], [], []>} : vector<64x128xbf16>, vector<128x256xbf16>, vector<64x256xf32> -> vector<64x256xf32>
    %c0_4 = arith.constant 0 : index
    %c0_5 = arith.constant 0 : index
    %6 = vector.load %arg6[%c0_4, %c0_5] : memref<1x256xf32, #tpu.memory_space<vmem>>, vector<1x256xf32>
    %7 = vector.broadcast %6 : vector<1x256xf32> to vector<64x256xf32>
    %8 = arith.addf %5, %7 : vector<64x256xf32>
    %9 = arith.truncf %8 : vector<64x256xf32> to vector<64x256xbf16>
    %cst_6 = arith.constant 2.000000e+01 : bf16
    %10 = vector.broadcast %cst_6 : bf16 to vector<64x256xbf16>
    %11 = arith.minimumf %9, %10 : vector<64x256xbf16>
    %12 = math.exp %11 : vector<64x256xbf16>
    %cst_7 = arith.constant 2.000000e+00 : bf16
    %13 = vector.broadcast %cst_7 : bf16 to vector<64x256xbf16>
    %14 = arith.addf %12, %13 : vector<64x256xbf16>
    %15 = arith.mulf %12, %14 : vector<64x256xbf16>
    %cst_8 = arith.constant 2.000000e+00 : bf16
    %16 = vector.broadcast %cst_8 : bf16 to vector<64x256xbf16>
    %17 = arith.addf %15, %16 : vector<64x256xbf16>
    %18 = arith.divf %15, %17 : vector<64x256xbf16>
    %19 = arith.mulf %9, %18 : vector<64x256xbf16>
    %c0_9 = arith.constant 0 : index
    %c0_10 = arith.constant 0 : index
    %20 = vector.load %arg11[%c0_9, %c0_10] : memref<64x128xf32, #tpu.memory_space<vmem>>, vector<64x128xf32>
    %c0_11 = arith.constant 0 : index
    %c0_12 = arith.constant 0 : index
    %21 = vector.load %arg7[%c0_11, %c0_12] : memref<256x128xbf16, #tpu.memory_space<vmem>>, vector<256x128xbf16>
    %cst_13 = arith.constant dense<0.000000e+00> : vector<64x128xf32>
    %22 = tpu.matmul %19, %21, %cst_13 {dimension_numbers = #tpu.dot_dimension_numbers<[1], [0], [0], [1], [0, 0, 1, 1], [], []>} : vector<64x256xbf16>, vector<256x128xbf16>, vector<64x128xf32> -> vector<64x128xf32>
    %23 = arith.addf %20, %22 : vector<64x128xf32>
    %c0_14 = arith.constant 0 : index
    %c0_15 = arith.constant 0 : index
    %24 = vector.load %arg11[%c0_14, %c0_15] : memref<64x128xf32, #tpu.memory_space<vmem>>, vector<64x128xf32>
    tpu.vector_store %arg11[%c0_14, %c0_15], %23 {strides = array<i32>} : memref<64x128xf32, #tpu.memory_space<vmem>>, vector<64x128xf32>,
    %c0_i32_16 = arith.constant 0 : i32
    %25 = arith.cmpi eq, %arg1, %c0_i32_16 : i32
    %26 = arith.extui %25 : i1 to i32
    %c0_i32_17 = arith.constant 0 : i32
    %27 = arith.cmpi ne, %26, %c0_i32_17 : i32
    scf.if %27 {
      %c0_18 = arith.constant 0 : index
      %c0_19 = arith.constant 0 : index
      %28 = vector.load %arg11[%c0_18, %c0_19] : memref<64x128xf32, #tpu.memory_space<vmem>>, vector<64x128xf32>
      %c0_20 = arith.constant 0 : index
      %c0_21 = arith.constant 0 : index
      %29 = vector.load %arg8[%c0_20, %c0_21] : memref<1x128xf32, #tpu.memory_space<vmem>>, vector<1x128xf32>
      %30 = vector.broadcast %29 : vector<1x128xf32> to vector<64x128xf32>
      %31 = arith.addf %28, %30 : vector<64x128xf32>
      %c0_22 = arith.constant 0 : index
      %c0_23 = arith.constant 0 : index
      %32 = vector.load %arg2[%c0_22, %c0_23] : memref<64x128xf32, #tpu.memory_space<vmem>>, vector<64x128xf32>
      %33 = arith.addf %31, %32 : vector<64x128xf32>
      %cst_24 = arith.constant 2.000000e+01 : f32
      %34 = vector.broadcast %cst_24 : f32 to vector<64x128xf32>
      %35 = arith.minimumf %33, %34 : vector<64x128xf32>
      %36 = math.exp %35 : vector<64x128xf32>
      %cst_25 = arith.constant 2.000000e+00 : f32
      %37 = vector.broadcast %cst_25 : f32 to vector<64x128xf32>
      %38 = arith.addf %36, %37 : vector<64x128xf32>
      %39 = arith.mulf %36, %38 : vector<64x128xf32>
      %40 = arith.mulf %33, %39 : vector<64x128xf32>
      %cst_26 = arith.constant 2.000000e+00 : f32
      %41 = vector.broadcast %cst_26 : f32 to vector<64x128xf32>
      %42 = arith.addf %39, %41 : vector<64x128xf32>
      %43 = tpu.reciprocal %42 {approx = true} : vector<64x128xf32> -> vector<64x128xf32>
      %44 = arith.mulf %40, %43 : vector<64x128xf32>
      %c0_27 = arith.constant 0 : index
      %c0_28 = arith.constant 0 : index
      %45 = vector.load %arg9[%c0_27, %c0_28] : memref<64x128xf32, #tpu.memory_space<vmem>>, vector<64x128xf32>
      tpu.vector_store %arg9[%c0_27, %c0_28], %44 {strides = array<i32>} : memref<64x128xf32, #tpu.memory_space<vmem>>, vector<64x128xf32>,
    } else {
    }
    return
  }
  func.func @transform_0(%arg0: i32, %arg1: i32) -> (i32, i32) {
    %c0_i32 = arith.constant 0 : i32
    %c0_i32_0 = arith.constant 0 : i32
    return %arg0, %c0_i32 : i32, i32
  }
  func.func @transform_1(%arg0: i32, %arg1: i32) -> (i32, i32) {
    %c0_i32 = arith.constant 0 : i32
    %c0_i32_0 = arith.constant 0 : i32
    %c0_i32_1 = arith.constant 0 : i32
    return %c0_i32, %c0_i32_0 : i32, i32
  }
  func.func @transform_2(%arg0: i32, %arg1: i32) -> (i32, i32) {
    %c0_i32 = arith.constant 0 : i32
    %c0_i32_0 = arith.constant 0 : i32
    %c0_i32_1 = arith.constant 0 : i32
    return %c0_i32, %c0_i32_0 : i32, i32
  }
  func.func @transform_3(%arg0: i32, %arg1: i32) -> (i32, i32) {
    %c0_i32 = arith.constant 0 : i32
    %c0_i32_0 = arith.constant 0 : i32
    return %c0_i32, %arg1 : i32, i32
  }
  func.func @transform_4(%arg0: i32, %arg1: i32) -> (i32, i32) {
    %c0_i32 = arith.constant 0 : i32
    %c0_i32_0 = arith.constant 0 : i32
    return %c0_i32, %arg1 : i32, i32
  }
  func.func @transform_5(%arg0: i32, %arg1: i32) -> (i32, i32) {
    %c0_i32 = arith.constant 0 : i32
    %c0_i32_0 = arith.constant 0 : i32
    return %arg1, %c0_i32 : i32, i32
  }
  func.func @transform_6(%arg0: i32, %arg1: i32) -> (i32, i32) {
    %c0_i32 = arith.constant 0 : i32
    %c0_i32_0 = arith.constant 0 : i32
    %c0_i32_1 = arith.constant 0 : i32
    return %c0_i32, %c0_i32_0 : i32, i32
  }
  func.func @transform_7(%arg0: i32, %arg1: i32) -> (i32, i32) {
    %c0_i32 = arith.constant 0 : i32
    %c0_i32_0 = arith.constant 0 : i32
    return %arg0, %c0_i32 : i32, i32
  }
}

</mosaic_0001>

<bundles_post_ra>
// kernel: tpu_custom_call.1
= control target key start
LH: loop header
LB: loop body
LE: loop exit
PB: predicated region body
PF: predicated region fallthrough
CT: control target
= control target key end

     0   :  { %12 = vsyncpa [#allocation5], 0  ;;  %s2297_s0 = inlined_call_operand.hbm [shape: f32[256,128], index: 0, kind: input, shape index: {}]   ;;  %s2298_s1 = inlined_call_operand.vmem [shape: f32[1,128], index: 1, kind: input, shape index: {}]   ;;  %s2299_s2 = inlined_call_operand.vmem [shape: f32[1,128], index: 2, kind: input, shape index: {}]   ;;  %s2300_s3 = inlined_call_operand.hbm [shape: bf16[128,256], index: 3, kind: input, shape index: {}]   ;;  %s2301_s4 = inlined_call_operand.vmem [shape: f32[1,256], index: 4, kind: input, shape index: {}]   ;;  %s2302_s5 = inlined_call_operand.hbm [shape: bf16[256,128], index: 5, kind: input, shape index: {}]   ;;  %s2303_s6 = inlined_call_operand.vmem [shape: f32[1,128], index: 6, kind: input, shape index: {}]   ;;  %s2304_s7 = inlined_call_operand.hbm [shape: f32[256,128], index: 7, kind: output, shape index: {}]  }
   0x1   :  { %14 = vsyncpa [#allocation5 + $0x1], 0 }
   0x2   :  { %15 = vsyncpa [#allocation8], 0 }
   0x3   :  { %16 = vsyncpa [#allocation6], 0 }
   0x4   :  { %18 = vsyncpa [#allocation6 + $0x1], 0  ;;  %s1826_s24 = smov 0   ;;  %s1828_s25 = smov 0  }
   0x5   :  { %s1830_s26 = smov 0   ;;  %s1832_s27 = smov 0  }
   0x6   :  { %s1834_s28 = smov 0   ;;  %s1836_s29 = smov 0  }
   0x7 LB: > { %2312 = sst [smem:[#allocation14_spill]] %s1752_s24  ;;  %s1292_s30 = sadd.s32 4294967295, %s1772_s29   ;;  %s1772_s29 = sphi %s1836_s29, %s24_s29   ;;  %s1768_s28 = sphi %s1834_s28, %s2334_s28   ;;  %s1764_s27 = sphi %s1832_s27, %s2333_s27   ;;  %s1760_s26 = sphi %s1830_s26, %s2332_s26   ;;  %s1756_s25 = sphi %s1828_s25, %s2331_s25   ;;  %s1752_s24 = sphi %s1826_s24, %s2330_s24  }
   0x8   : > { %s1293_s8 = sadd.s32 4294967294, %s1772_s29   ;;  %p56_p0 = scmp.ne.s32.totalorder %s1756_s25, %s1752_s24 }
   0x9   : > { %p1860_p1 = scmp.eq.s32.totalorder %s1292_s30, 0  ;;  %p1864_p2 = scmp.eq.s32.totalorder %s1292_s30, 3 }
   0xa   : > { %p227_p3 = scmp.eq.s32.totalorder %s1293_s8, 3  ;;  %p1294_p5 = scmp.ge.s32.totalorder %s1772_s29, 1 }
   0xb   : > { %s2313_s9 = scalar_select %p1860_p1, 1, 0 }
   0xc   : > { %s2314_s10 = scalar_select %p1864_p2, 1, 0 }
   0xd   : > { %p1870_p4 = por %p1860_p1, %p56_p0  ;;  %p1875_p6 = por %p227_p3, %p56_p0 }
   0xe   : > { %p234_p7 = scmp.lt.s32.totalorder %s1772_s29, 5  ;;  %s1774_s14 = smov [#allocation7]  }
   0xf   : > { %s2315_s11 = scalar_select %p1870_p4, 1, 0 }
  0x10   : > { %s2316_s12 = scalar_select %p1875_p6, 1, 0 }
  0x11   : > { %p1880_p8 = pnand %p1294_p5, %p234_p7  ;;  %s255_s15 = sshll.u32 %s1774_s14, 4  ;;  %s256_s15 = int_to_ptr.vmem [resolvable:$true] %s255_s15 }
  0x12   : > { %2317 = sst [smem:[#allocation15_spill]] %s2316_s12  ;;  %s1775_s17 = smov [#allocation9]  }
  0x13   : > { %s2318_s13 = scalar_select %p1880_p8, 1, 0 }
  0x14   : > { %p1401_p9 = pneg %p1880_p8  ;;  %s279_s18 = sshll.u32 %s1775_s17, 4  ;;  %s1892_s18 = int_to_ptr.vmem [resolvable:$true] %s279_s18 }
  0x15   : > { %s1600_s21 = scalar_lea.hbm %s2300_s3, 2048 }
  0x16   : > { %p1888_p10 = pnand %p1401_p9, %p1860_p1  ;;  %p1601_p11 = scmp.ne.s32.totalorder %s2300_s3, %s1600_s21 }
  0x17   : > { %p1607_p3 = scmp.lt.u32.totalorder %s1600_s21, %s2300_s3 }
  0x18   : > { %p1602_p12 = pneg %p1888_p10 }
  0x1a   : > { %p1603_p13 = pnand %p1602_p12, %p1601_p11 }
  0x1c   : > { %p1604_p0 = pneg %p1603_p13 }
  0x1e   : > { %p1609_p5 = pnand %p1607_p3, %p1604_p0 }
  0x20   : > { %1612 = shalt.err (!%p1609_p5)
}
  0x21   : > { %s1613_s14 = scalar_lea.vmem %s256_s15, 2048  ;;  %p1621_p1 = scmp.lt.s32.totalorder %s256_s15, %s256_s15 }
  0x22   : > { %p1614_p7 = scmp.ne.s32.totalorder %s256_s15, %s1613_s14  ;;  %p1622_p4 = scmp.lt.s32.totalorder %s1613_s14, %s1613_s14 }
  0x24   : > { %p1616_p9 = pnand %p1614_p7, %p1602_p12  ;;  %p1623_p8 = por %p1622_p4, %p1621_p1 }
  0x26   : > { %p1617_p6 = pneg %p1616_p9 }
  0x28   : > { %p1624_p2 = pnand %p1623_p8, %p1617_p6 }
  0x2a   : > { %1627 = shalt.err (!%p1624_p2)
}
  0x2b   : > { %s2311_s17 = smov 128   ;;  %s1777_s19 = smov 8  }
  0x2c   : > { %1404 = dma.hbm_to_vmem [thread:$0]  (!%p1888_p10), %s2300_s3, 2048, %s256_s15, [#allocation8], %s2311_s17, %s2311_s17, %s1777_s19  }
  0x2d   : > { %s1628_s30 = scalar_lea.hbm %s2302_s5, 2048 }
  0x2e   : > { %p1629_p1 = scmp.ne.s32.totalorder %s2302_s5, %s1628_s30  ;;  %p1635_p6 = scmp.lt.u32.totalorder %s1628_s30, %s2302_s5 }
  0x30   : > { %p1631_p2 = pnand %p1629_p1, %p1602_p12 }
  0x32   : > { %p1632_p4 = pneg %p1631_p2 }
  0x34   : > { %p1637_p8 = pnand %p1635_p6, %p1632_p4 }
  0x36   : > { %1640 = shalt.err (!%p1637_p8)
}
  0x37   : > { %s1641_s15 = scalar_lea.vmem %s1892_s18, 2048  ;;  %p1649_p3 = scmp.lt.s32.totalorder %s1892_s18, %s1892_s18 }
  0x38   : > { %p1642_p11 = scmp.ne.s32.totalorder %s1892_s18, %s1641_s15  ;;  %p1650_p5 = scmp.lt.s32.totalorder %s1641_s15, %s1641_s15 }
  0x3a   : > { %p1644_p13 = pnand %p1642_p11, %p1602_p12  ;;  %p1651_p7 = por %p1650_p5, %p1649_p3 }
  0x3c   : > { %p1645_p0 = pneg %p1644_p13 }
  0x3e   : > { %p1652_p9 = pnand %p1651_p7, %p1645_p0 }
  0x40   : > { %1655 = shalt.err (!%p1652_p9)
}
  0x41   : > { %s1778_s24 = smov 64   ;;  %s1779_s12 = smov 4  }
  0x42   : > { %1407 = dma.hbm_to_vmem [thread:$0]  (!%p1888_p10), %s2302_s5, 2048, %s1892_s18, [#allocation8], %s1778_s24, %s1778_s24, %s1779_s12  }
  0x43   : > { %s36_s22 = sadd.s32 1, %s1768_s28  ;;  %s43_s23 = sadd.s32 1, %s1760_s26 }
  0x44   : > { %p38_p12 = scmp.ge.s32.totalorder %s36_s22, 4  ;;  %p50_p1 = scmp.ne.s32.totalorder %s1760_s26, %s1756_s25 }
  0x45   : > { %p51_p2 = scmp.eq.s32.totalorder %s1772_s29, 0  ;;  %p1418_p4 = scmp.lt.s32.totalorder %s1772_s29, 4 }
  0x46   : > { %s2336_s22 = smov (%p38_p12, %s36_s22), 0  ;;  %p2320_p8 = scmp.ne.s32.totalorder %s2314_s10, 0 }
  0x47   : > { %p52_p6 = por %p51_p2, %p50_p1  ;;  %s40_s16 = ssub.s32 %s1768_s28, %s2336_s22 }
  0x48   : > { %p1954_p11 = por %p2320_p8, %p50_p1  ;;  %s296_s8 = sand.u32 1, %s1760_s26  }
  0x49   : > { %p41_p13 = scmp.eq.s32.totalorder %s40_s16, 0  ;;  %s1299_s18 = sshll.u32 %s296_s8, 6 }
  0x4a   : > { %s1347_s14 = sshll.u32 %s1768_s28, 10  ;;  %s300_s10 = scalar_lea.vmem [#allocation4], %s1299_s18 }
  0x4b   : > { %s1963_s15 = scalar_select %p41_p13, %s1760_s26, %s43_s23  }
  0x4c   : > { %s1968_s20 = scalar_lea.hbm %s2297_s0, %s1347_s14  ;;  %s307_s21 = sshll.u32 %s300_s10, 4  ;;  %s1976_s21 = int_to_ptr.vmem [resolvable:$true] %s307_s21 }
  0x4d   : > { %p1972_p10 = pnand %p1418_p4, %p52_p6  ;;  %s1978_s23 = scalar_lea.sflag [#allocation5], %s296_s8 }
  0x4e   : > { %s1656_s16 = scalar_lea.hbm %s1968_s20, 1024  ;;  %s1661_s24 = scalar_lea.hbm %s2297_s0, 4096 }
  0x4f   : > { %p1657_p0 = scmp.ne.s32.totalorder %s1968_s20, %s1656_s16  ;;  %p1658_p3 = pneg %p1972_p10 }
  0x50   : > { %p1662_p9 = scmp.lt.u32.totalorder %s1968_s20, %s2297_s0  ;;  %p1663_p12 = scmp.lt.u32.totalorder %s1661_s24, %s1656_s16 }
  0x51   : > { %p1659_p5 = pnand %p1658_p3, %p1657_p0  ;;  %p1665_p2 = scmp.lt.u32.totalorder %s1656_s16, %s1968_s20 }
  0x52   : > { %p1664_p1 = por %p1663_p12, %p1662_p9 }
  0x53   : > { %p1660_p7 = pneg %p1659_p5 }
  0x54   : > { %p1666_p4 = por %p1665_p2, %p1664_p1 }
  0x56   : > { %p1667_p6 = pnand %p1666_p4, %p1660_p7 }
  0x58   : > { %1670 = shalt.err (!%p1667_p6)
}
  0x59   : > { %s1671_s8 = scalar_lea.vmem %s1976_s21, 1024  ;;  %s1780_s18 = smov [#allocation4]  }
  0x5a   : > { %p1672_p8 = scmp.ne.s32.totalorder %s1976_s21, %s1671_s8  ;;  %s1676_s14 = sshll.u32 %s1780_s18, 4  ;;  %s1677_s14 = int_to_ptr.vmem [resolvable:$false] %s1676_s14 }
  0x5b   : > { %s1678_s12 = scalar_lea.vmem %s1677_s14, 2048  ;;  %p1679_p5 = scmp.lt.s32.totalorder %s1976_s21, %s1677_s14 }
  0x5c   : > { %p1674_p13 = pnand %p1672_p8, %p1658_p3  ;;  %p1680_p9 = scmp.lt.s32.totalorder %s1678_s12, %s1671_s8 }
  0x5e   : > { %p1675_p0 = pneg %p1674_p13  ;;  %p1681_p12 = por %p1680_p9, %p1679_p5 }
  0x60   : > { %p1682_p1 = pnand %p1681_p12, %p1675_p0 }
  0x62   : > { %1685 = shalt.err (!%p1682_p1)
}
  0x63   : > { %s2323_s16 = smov 128   ;;  %p2324_p3 = scmp.ne.s32.totalorder %s2318_s13, 0 }
  0x64   : > { %1411 = dma.hbm_to_vmem [thread:$0]  (!%p1972_p10), %s1968_s20, 1024, %s1976_s21, %s1978_s23, %s2323_s16, %s2323_s16, %s1777_s19  }
  0x65   : > { %319 = sbr.rel (%p2324_p3) target bundleno = 840 (0x348), region = 48  ;;  %s2012_s24 = sand.u32 (!%p2324_p3), 1, %s1756_s25  }
  0x66   : > { %s1303_s10 = sshll.u32 (!%p2324_p3), %s2012_s24, 6  ;;  %s322_s8 = scalar_lea.sflag (!%p2324_p3), [#allocation5], %s2012_s24 }
  0x67   : > { %s2018_s17 = scalar_lea.vmem (!%p2324_p3), [#allocation4], %s1303_s10  ;;  %p2325_p7 = scmp.ne.s32.totalorder (!%p2324_p3), %s2315_s11, 0 }
  0x6c   : > { %1739 = dma.done.wait (%p2325_p7), %s322_s8, 1024  }
  0x6d   : > { %1741 = vsyncadd (%p2325_p7), %s322_s8, 4294966272  ;;  %p2326_p10 = scmp.ne.s32.totalorder %s2313_s9, 0 }
  0x6f   : > { %1743 = dma.done.wait (%p2326_p10), [#allocation8], 4096  }
  0x70   : > { %1745 = vsyncadd (%p2326_p10), [#allocation8], 4294963200  ;;  %v2029_v0 = vld [vmem:[%s2018_s17] sm:$0xff]  ;;  %v2032_v1 = vld [vmem:[%s2018_s17 + $0x8] sm:$0xff]  ;;  %v1781_v32 = vmov 0   ;;  %s2226_s14 = scalar_lea.vmem [#allocation10], %s1303_s10 }
  0x71   : > { %392 = vadd.xlane.f32.xlu0 %v2029_v0  ;;  %v408_v2 = vmul.f32 %v2029_v0, %v2029_v0  ;;  %v409_v3 = vmul.f32 %v2032_v1, %v2032_v1  ;;  %v2040_v4 = vld [vmem:[%s2018_s17 + $0x10] sm:$0xff]  ;;  %v2044_v5 = vld [vmem:[%s2018_s17 + $0x18] sm:$0xff]  ;;  %v2053_v8 = vld [vmem:[%s2018_s17 + $0x20] sm:$0xff]  ;;  %694 = vmatprep.mubr.bf16.mxu0 %v1781_v32  ;;  %s1348_s12 = sshll.u32 %s1764_s27, 10  ;;  %s1176_s16 = sshll.u32 %s2226_s14, 4  ;;  %s2247_s16 = int_to_ptr.vmem [resolvable:$true] %s1176_s16 }
  0x72   : > { %v410_v6 = vmul.f32 %v2040_v4, %v2040_v4  ;;  %v411_v7 = vmul.f32 %v2044_v5, %v2044_v5  ;;  %v2056_v9 = vld [vmem:[%s2018_s17 + $0x28] sm:$0xff]  ;;  %v412_v12 = vmul.f32 %v2053_v8, %v2053_v8  ;;  %v1483_v13 = vld [vmem:[#allocation7 + $0x14] ss:$8 sps:$4 sm:$0xff]   ;;  %v1485_v15 = vld [vmem:[#allocation7 + $0x10] ss:$8 sps:$4 sm:$0xff]   ;;  %s1163_s27 = scalar_lea.sflag [#allocation6], %s2012_s24 }
  0x73   : > { %416 = vadd.xlane.f32.xlu1 %v408_v2  ;;  %v1480_v10 = vld [vmem:[#allocation7 + $0x4] ss:$8 sps:$4 sm:$0xff]   ;;  %v1482_v11 = vld [vmem:[#allocation7] ss:$8 sps:$4 sm:$0xff]   ;;  %v413_v14 = vmul.f32 %v2056_v9, %v2056_v9  ;;  %v2065_v16 = vld [vmem:[%s2018_s17 + $0x30] sm:$0xff]  ;;  %s1686_s9 = scalar_lea.vmem %s2247_s16, 1024 }
  0x74   : > { %662 = vmatprep.subr.bf16.mxu0 %v1480_v10  ;;  %v1486_v17 = vld [vmem:[#allocation7 + $0x24] ss:$8 sps:$4 sm:$0xff]   ;;  %v2068_v18 = vld [vmem:[%s2018_s17 + $0x38] sm:$0xff]  ;;  %v1488_v19 = vld [vmem:[#allocation7 + $0x20] ss:$8 sps:$4 sm:$0xff]   ;;  %v414_v20 = vmul.f32 %v2065_v16, %v2065_v16  ;;  %s2245_s17 = scalar_lea.hbm %s2304_s7, %s1348_s12  ;;  %p1687_p2 = scmp.ne.s32.totalorder %s2247_s16, %s1686_s9 }
  0x75   : > { %394 = vadd.xlane.f32.xlu0 %v2032_v1  ;;  %663 = vmatpush1.bf16.msra.mxu0 %v1482_v11  ;;  %v415_v21 = vmul.f32 %v2068_v18, %v2068_v18  ;;  %v1489_v22 = vld [vmem:[#allocation7 + $0x34] ss:$8 sps:$4 sm:$0xff]   ;;  %v1491_v23 = vld [vmem:[#allocation7 + $0x30] ss:$8 sps:$4 sm:$0xff]   ;;  %v1492_v24 = vld [vmem:[#allocation7 + $0x44] ss:$8 sps:$4 sm:$0xff]  }
  0x76   : > { %664 = vmatprep.subr.bf16.mxu0 %v1483_v13  ;;  %v1494_v25 = vld [vmem:[#allocation7 + $0x40] ss:$8 sps:$4 sm:$0xff]   ;;  %v1495_v26 = vld [vmem:[#allocation7 + $0x54] ss:$8 sps:$4 sm:$0xff]   ;;  %v1497_v27 = vld [vmem:[#allocation7 + $0x50] ss:$8 sps:$4 sm:$0xff]   ;;  %p1688_p4 = pnand %p1687_p2, %p1954_p11 }
  0x77   : > { %418 = vadd.xlane.f32.xlu1 %v409_v3  ;;  %v1498_v28 = vld [vmem:[#allocation7 + $0x64] ss:$8 sps:$4 sm:$0xff]   ;;  %v1500_v29 = vld [vmem:[#allocation7 + $0x60] ss:$8 sps:$4 sm:$0xff]   ;;  %v1501_v30 = vld [vmem:[#allocation7 + $0x74] ss:$8 sps:$4 sm:$0xff]  }
  0x78   : > { %v1503_v31 = vld [vmem:[#allocation7 + $0x70] ss:$8 sps:$4 sm:$0xff]   ;;  %p1689_p6 = pneg %p1688_p4  ;;  %s1783_s11 = smov [#allocation10]  }
  0x79   : > { %396 = vadd.xlane.f32.xlu0 %v2040_v4  ;;  %665 = vmatpush1.bf16.msra.mxu0 %v1485_v15  ;;  %s1690_s13 = sshll.u32 %s1783_s11, 4  ;;  %s1691_s13 = int_to_ptr.vmem [resolvable:$false] %s1690_s13 }
  0x7a   : > { %666 = vmatprep.subr.bf16.mxu0 %v1486_v17  ;;  %s1692_s19 = scalar_lea.vmem %s1691_s13, 2048  ;;  %p1693_p8 = scmp.lt.s32.totalorder %s2247_s16, %s1691_s13 }
  0x7b   : > { %398 = vadd.xlane.f32.xlu1 %v2044_v5  ;;  %p1694_p13 = scmp.lt.s32.totalorder %s1692_s19, %s1686_s9 }
  0x7d   : > { %420 = vadd.xlane.f32.xlu0 %v410_v6  ;;  %667 = vmatpush1.bf16.msra.mxu0 %v1488_v19  ;;  %p1695_p0 = por %p1694_p13, %p1693_p8 }
  0x7e   : > { %668 = vmatprep.subr.bf16.mxu0 %v1489_v22 }
  0x7f   : > { %422 = vadd.xlane.f32.xlu1 %v411_v7  ;;  %p1696_p5 = pnand %p1695_p0, %p1689_p6 }
  0x81   : > { %400 = vadd.xlane.f32.xlu0 %v2053_v8  ;;  %669 = vmatpush1.bf16.msra.mxu0 %v1491_v23  ;;  %v2097_v23 = vld [vmem:[%s2298_s1] ss:$0 sm:$0xff] }
  0x82   : > { %670 = vmatprep.subr.bf16.mxu0 %v1492_v24 }
  0x83   : > { %402 = vadd.xlane.f32.xlu1 %v2056_v9 }
  0x85   : > { %424 = vadd.xlane.f32.xlu0 %v412_v12  ;;  %671 = vmatpush1.bf16.msra.mxu0 %v1494_v25 }
  0x86   : > { %672 = vmatprep.subr.bf16.mxu0 %v1495_v26 }
  0x87   : > { %426 = vadd.xlane.f32.xlu1 %v413_v14 }
  0x89   : > { %404 = vadd.xlane.f32.xlu0 %v2065_v16  ;;  %673 = vmatpush1.bf16.msra.mxu0 %v1497_v27 }
  0x8a   : > { %674 = vmatprep.subr.bf16.mxu0 %v1498_v28 }
  0x8b   : > { %406 = vadd.xlane.f32.xlu1 %v2068_v18 }
  0x8d   : > { %428 = vadd.xlane.f32.xlu0 %v414_v20  ;;  %675 = vmatpush1.bf16.msra.mxu0 %v1500_v29 }
  0x8e   : > { %676 = vmatprep.subr.bf16.mxu0 %v1501_v30 }
  0x8f   : > { %430 = vadd.xlane.f32.xlu1 %v415_v21 }
  0x91   : > { %677 = vmatpush1.bf16.msra.mxu0 %v1503_v31 }
  0xfe   : > { %v393_v33 = vpop.xlane.xlu0 %392 }
  0xff   : > { %v432_v34 = vmul.f32 0.0078125, %v393_v33 }
 0x100   : > { %v417_v35 = vpop.xlane.xlu1 %416 }
 0x101   : > { %v448_v36 = vmul.f32 %v432_v34, %v432_v34  ;;  %v440_v37 = vmul.f32 0.0078125, %v417_v35  ;;  %v472_v10 = vsub.f32 %v2029_v0, %v432_v34 }
 0x102   : > { %v395_v38 = vpop.xlane.xlu0 %394 }
 0x103   : > { %v456_v39 = vsub.f32 %v440_v37, %v448_v36  ;;  %v433_v40 = vmul.f32 0.0078125, %v395_v38  ;;  %v1308_v37 = vld [vmem:[%s2299_s2] ss:$0 sm:$0xff] }
 0x104   : > { %v419_v41 = vpop.xlane.xlu1 %418 }
 0x105   : > { %v464_v42 = vmax.f32 %v456_v39, 0.0  ;;  %v449_v43 = vmul.f32 %v433_v40, %v433_v40  ;;  %v441_v44 = vmul.f32 0.0078125, %v419_v41  ;;  %v473_v24 = vsub.f32 %v2032_v1, %v433_v40 }
 0x106   : > { %v397_v45 = vpop.xlane.xlu0 %396 }
 0x107   : > { %v480_v46 = vadd.f32 1e-05, %v464_v42  ;;  %v457_v47 = vsub.f32 %v441_v44, %v449_v43  ;;  %v2077_v48 = vmul.f32 0.0078125, %v397_v45 }
 0x108   : > { %v399_v49 = vpop.xlane.xlu1 %398 }
 0x109   : > { %1520 = vrsqrt.f32 %v480_v46  ;;  %v465_v50 = vmax.f32 %v457_v47, 0.0  ;;  %v450_v51 = vmul.f32 %v2077_v48, %v2077_v48  ;;  %v2081_v52 = vmul.f32 0.0078125, %v399_v49 }
 0x10a   : > { %v421_v53 = vpop.xlane.xlu0 %420  ;;  %v474_v43 = vsub.f32 %v2040_v4, %v2077_v48 }
 0x10b   : > { %v481_v54 = vadd.f32 1e-05, %v465_v50  ;;  %v442_v55 = vmul.f32 0.0078125, %v421_v53  ;;  %v451_v57 = vmul.f32 %v2081_v52, %v2081_v52  ;;  %v475_v53 = vsub.f32 %v2044_v5, %v2081_v52 }
 0x10c   : > { %v423_v56 = vpop.xlane.xlu1 %422 }
 0x10d   : > { %1522 = vrsqrt.f32 %v481_v54  ;;  %v458_v58 = vsub.f32 %v442_v55, %v450_v51  ;;  %v443_v59 = vmul.f32 0.0078125, %v423_v56 }
 0x10e   : > { %v401_v60 = vpop.xlane.xlu0 %400 }
 0x10f   : > { %v466_v61 = vmax.f32 %v458_v58, 0.0  ;;  %v459_v62 = vsub.f32 %v443_v59, %v451_v57  ;;  %v2085_v63 = vmul.f32 0.0078125, %v401_v60 }
 0x110   : > { %v403_v2 = vpop.xlane.xlu1 %402 }
 0x111   : > { %v482_v3 = vadd.f32 1e-05, %v466_v61  ;;  %v467_v6 = vmax.f32 %v459_v62, 0.0  ;;  %v452_v7 = vmul.f32 %v2085_v63, %v2085_v63  ;;  %v2090_v11 = vmul.f32 0.0078125, %v403_v2 }
 0x112   : > { %v425_v12 = vpop.xlane.xlu0 %424  ;;  %v476_v52 = vsub.f32 %v2053_v8, %v2085_v63 }
 0x113   : > { %v1521_v13 = vpop.eup %1520  ;;  %1524 = vrsqrt.f32 %v482_v3  ;;  %v483_v14 = vadd.f32 1e-05, %v467_v6  ;;  %v444_v15 = vmul.f32 0.0078125, %v425_v12  ;;  %v453_v20 = vmul.f32 %v2090_v11, %v2090_v11 }
 0x114   : > { %v427_v17 = vpop.xlane.xlu1 %426  ;;  %v496_v19 = vmul.f32 %v1521_v13, %v472_v10  ;;  %v477_v10 = vsub.f32 %v2056_v9, %v2090_v11 }
 0x115   : > { %1526 = vrsqrt.f32 %v483_v14  ;;  %v460_v21 = vsub.f32 %v444_v15, %v452_v7  ;;  %v445_v22 = vmul.f32 0.0078125, %v427_v17 }
 0x116   : > { %v405_v25 = vpop.xlane.xlu0 %404  ;;  %v511_v33 = vmul.f32 %v2097_v23, %v496_v19 }
 0x117   : > { %v1523_v26 = vpop.eup %1522  ;;  %v468_v27 = vmax.f32 %v460_v21, 0.0  ;;  %v461_v28 = vsub.f32 %v445_v22, %v453_v20  ;;  %v438_v29 = vmul.f32 0.0078125, %v405_v25 }
 0x118   : > { %v407_v30 = vpop.xlane.xlu1 %406  ;;  %v497_v31 = vmul.f32 %v1523_v26, %v473_v24  ;;  %v526_v45 = vadd.f32 %v1308_v37, %v511_v33 }
 0x119   : > { %v484_v34 = vadd.f32 1e-05, %v468_v27  ;;  %v469_v35 = vmax.f32 %v461_v28, 0.0  ;;  %v454_v36 = vmul.f32 %v438_v29, %v438_v29  ;;  %v439_v38 = vmul.f32 0.0078125, %v407_v30 }
 0x11a   : > { %v429_v39 = vpop.xlane.xlu0 %428  ;;  %v512_v40 = vmul.f32 %v2097_v23, %v497_v31  ;;  %v478_v63 = vsub.f32 %v2065_v16, %v438_v29  ;;  %v1504_v29 = vld [vmem:[#allocation9 + $0x40] sm:$0xff]  }
 0x11b   : > { %1528 = vrsqrt.f32 %v484_v34  ;;  %v485_v41 = vadd.f32 1e-05, %v469_v35  ;;  %v446_v42 = vmul.f32 0.0078125, %v429_v39  ;;  %v455_v49 = vmul.f32 %v439_v38, %v439_v38  ;;  %v1505_v35 = vld [vmem:[#allocation9] sm:$0xff]   ;;  %1349 = vmatprep.subr.bf16.mxu1 %v1504_v29  ;;  %v1508_v39 = vld [vmem:[#allocation9 + $0x50] sm:$0xff]  }
 0x11c   : > { %v431_v44 = vpop.xlane.xlu1 %430  ;;  %v527_v46 = vadd.f32 %v1308_v37, %v512_v40  ;;  %v479_v24 = vsub.f32 %v2068_v18, %v439_v38  ;;  %1350 = vmatpush3.bf16.msra.mxu1 %v1505_v35  ;;  %v1507_v38 = vld [vmem:[#allocation9 + $0x8] sm:$0xff]   ;;  %v1509_v40 = vld [vmem:[#allocation9 + $0x10] sm:$0xff]  }
 0x11d   : > { %v1525_v47 = vpop.eup %1524  ;;  %1530 = vrsqrt.f32 %v485_v41  ;;  %v462_v50 = vsub.f32 %v446_v42, %v454_v36  ;;  %v447_v51 = vmul.f32 0.0078125, %v431_v44  ;;  %v1506_v36 = vld [vmem:[#allocation9 + $0x48] sm:$0xff]   ;;  %v1510_v41 = vld [vmem:[#allocation9 + $0x58] sm:$0xff]   ;;  %v1516_v44 = vld [vmem:[#allocation9 + $0x70] sm:$0xff]  }
 0x11e   : > { %v534_v54 = vpack.c.bf16 %v527_v46, %v526_v45  ;;  %v498_v55 = vmul.f32 %v1525_v47, %v474_v43  ;;  %1351 = vmatprep.subr.bf16.mxu1 %v1506_v36  ;;  %v1514_v42 = vld [vmem:[#allocation9 + $0x68] sm:$0xff]   ;;  %v1517_v45 = vld [vmem:[#allocation9 + $0x30] sm:$0xff]   ;;  %v1518_v46 = vld [vmem:[#allocation9 + $0x78] sm:$0xff]  }
 0x11f   : > { %v1527_v56 = vpop.eup %1526  ;;  %v470_v57 = vmax.f32 %v462_v50, 0.0  ;;  %v463_v58 = vsub.f32 %v447_v51, %v455_v49  ;;  %v1515_v43 = vld [vmem:[#allocation9 + $0x28] sm:$0xff]   ;;  %v1519_v47 = vld [vmem:[#allocation9 + $0x38] sm:$0xff]   ;;  %v572_v49 = vlaneseq }
 0x120   : > { %695 = vmatmul.mubr.bf16.vlgmr.msra.gmra.mrb[0].mxu0 %v534_v54  ;;  %v499_v59 = vmul.f32 %v1527_v56, %v475_v53  ;;  %v513_v48 = vmul.f32 %v2097_v23, %v498_v55  ;;  %1352 = vmatpush3.bf16.msra.mxu1 %v1507_v38  ;;  %v570_v53 = vld [vmem:[%s2301_s4] sm:$0x3] }
 0x121   : > { %v486_v60 = vadd.f32 1e-05, %v470_v57  ;;  %v471_v61 = vmax.f32 %v463_v58, 0.0  ;;  %704 = vmatprep.mubr.bf16.mxu0 %v1781_v32  ;;  %1353 = vmatprep.subr.bf16.mxu1 %v1508_v39  ;;  %v573_v50 = vshrl.u32 %v572_v49, 7 }
 0x122   : > { %v514_v62 = vmul.f32 %v2097_v23, %v499_v59  ;;  %v528_v3 = vadd.f32 %v1308_v37, %v513_v48 }
 0x123   : > { %1532 = vrsqrt.f32 %v486_v60  ;;  %v487_v2 = vadd.f32 1e-05, %v471_v61  ;;  %v574_v51 = vsub.s32 0, %v573_v50  ;;  %v578_v54 = vsub.s32 1, %v573_v50 }
 0x124   : > { %v529_v6 = vadd.f32 %v1308_v37, %v514_v62  ;;  %1354 = vmatpush3.bf16.msra.mxu1 %v1509_v40 }
 0x125   : > { %v1529_v7 = vpop.eup %1528  ;;  %1534 = vrsqrt.f32 %v487_v2  ;;  %1355 = vmatprep.subr.bf16.mxu1 %v1510_v41  ;;  %v575_v55 = vrot.slane %v570_v53, %v574_v51  ;;  %v2127_v57 = vrot.slane %v570_v53, %v578_v54 }
 0x126   : > { %v535_v12 = vpack.c.bf16 %v529_v6, %v528_v3  ;;  %v500_v13 = vmul.f32 %v1529_v7, %v476_v52  ;;  %v1782_v6 = vmov 1101021600  }
 0x127   : > { %v1531_v14 = vpop.eup %1530 }
 0x128   : > { %705 = vmatmul.mubr.bf16.gmra.mrb[4].mxu0 %v535_v12  ;;  %v501_v15 = vmul.f32 %v1531_v14, %v477_v10  ;;  %v515_v17 = vmul.f32 %v2097_v23, %v500_v13 }
 0x129   : > { %714 = vmatprep.mubr.bf16.mxu0 %v1781_v32 }
 0x12a   : > { %v516_v19 = vmul.f32 %v2097_v23, %v501_v15  ;;  %v530_v20 = vadd.f32 %v1308_v37, %v515_v17 }
 0x12c   : > { %v531_v21 = vadd.f32 %v1308_v37, %v516_v19 }
 0x12d   : > { %v1533_v22 = vpop.eup %1532 }
 0x12e   : > { %v536_v25 = vpack.c.bf16 %v531_v21, %v530_v20  ;;  %v502_v11 = vmul.f32 %v1533_v22, %v478_v63 }
 0x12f   : > { %v1535_v26 = vpop.eup %1534 }
 0x130   : > { %715 = vmatmul.mubr.bf16.gmra.mrb[8].mxu0 %v536_v25  ;;  %v503_v27 = vmul.f32 %v1535_v26, %v479_v24  ;;  %v517_v28 = vmul.f32 %v2097_v23, %v502_v11 }
 0x131   : > { %724 = vmatprep.mubr.bf16.mxu0 %v1781_v32  ;;  %v1511_v32 = vld [vmem:[#allocation9 + $0x18] sm:$0xff]  }
 0x132   : > { %v518_v30 = vmul.f32 %v2097_v23, %v503_v27  ;;  %v532_v31 = vadd.f32 %v1308_v37, %v517_v28  ;;  %1356 = vmatpush3.bf16.msra.mxu1 %v1511_v32  ;;  %v1512_v23 = vld [vmem:[#allocation9 + $0x60] sm:$0xff]  }
 0x133   : > { %1357 = vmatprep.subr.bf16.mxu1 %v1512_v23 }
 0x134   : > { %v533_v33 = vadd.f32 %v1308_v37, %v518_v30  ;;  %v1513_v37 = vld [vmem:[#allocation9 + $0x20] sm:$0xff]  }
 0x136   : > { %v537_v34 = vpack.c.bf16 %v533_v33, %v532_v31  ;;  %1358 = vmatpush3.bf16.msra.mxu1 %v1513_v37 }
 0x137   : > { %1359 = vmatprep.subr.bf16.mxu1 %v1514_v42 }
 0x138   : > { %725 = vmatmul.mubr.bf16.gmra.mrb[12].mxu0 %v537_v34 }
 0x13a   : > { %1360 = vmatpush3.bf16.msra.mxu1 %v1515_v43 }
 0x13b   : > { %1361 = vmatprep.subr.bf16.mxu1 %v1516_v44 }
 0x13e   : > { %1362 = vmatpush3.bf16.msra.mxu1 %v1517_v45 }
 0x13f   : > { %1363 = vmatprep.subr.bf16.mxu1 %v1518_v46 }
 0x142   : > { %1364 = vmatpush3.bf16.msra.mxu1 %v1519_v47 }
 0x1f3   : > { %v696_v56 = vpop.f32.mrb[0].mxu0 }
 0x1f4   : > { %v698_v58 = vpop.f32.mrb[1].mxu0  ;;  %v697_v48 = vadd.f32 %v696_v56, %v575_v55 }
 0x1f5   : > { %v700_v59 = vpop.f32.mrb[2].mxu0  ;;  %v699_v62 = vadd.f32 %v698_v58, %v2127_v57 }
 0x1f6   : > { %v701_v60 = vadd.f32 %v700_v59, %v575_v55  ;;  %v702_v61 = vpop.f32.mrb[3].mxu0 }
 0x1f7   : > { %v703_v2 = vadd.f32 %v702_v61, %v2127_v57 }
 0x1f8   : > { %v2131_v52 = vpack.c.bf16 %v701_v60, %v697_v48 }
 0x1f9   : > { %v2133_v3 = vpack.c.bf16 %v703_v2, %v699_v62 }
 0x1fa   : > { %v743_v7 = vmin.bf16 %v1782_v6, %v2131_v52 }
 0x1fb   : > { %v706_v10 = vpop.f32.mrb[4].mxu0  ;;  %v744_v12 = vmin.bf16 %v1782_v6, %v2133_v3 }
 0x1fc   : > { %v752_v13 = vmul.bf16 1069105081, %v743_v7  ;;  %v708_v14 = vpop.f32.mrb[5].mxu0  ;;  %v707_v19 = vadd.f32 %v706_v10, %v575_v55 }
 0x1fd   : > { %v710_v15 = vpop.f32.mrb[6].mxu0  ;;  %v755_v17 = vmul.bf16 1069105081, %v744_v12  ;;  %v709_v21 = vadd.f32 %v708_v14, %v2127_v57 }
 0x1fe   : > { %1536 = vpow.bf16 %v752_v13  ;;  %v711_v63 = vadd.f32 %v710_v15, %v575_v55  ;;  %v712_v20 = vpop.f32.mrb[7].mxu0 }
 0x1ff   : > { %v713_v22 = vadd.f32 %v712_v20, %v2127_v57  ;;  %1538 = vpow.bf16 %v755_v17 }
 0x200   : > { %v2141_v24 = vpack.c.bf16 %v711_v63, %v707_v19 }
 0x201   : > { %v2143_v25 = vpack.c.bf16 %v713_v22, %v709_v21 }
 0x202   : > { %v745_v11 = vmin.bf16 %v1782_v6, %v2141_v24 }
 0x203   : > { %v746_v26 = vmin.bf16 %v1782_v6, %v2143_v25  ;;  %v716_v27 = vpop.f32.mrb[8].mxu0 }
 0x204   : > { %v758_v28 = vmul.bf16 1069105081, %v745_v11  ;;  %v718_v30 = vpop.f32.mrb[9].mxu0  ;;  %v717_v34 = vadd.f32 %v716_v27, %v575_v55 }
 0x205   : > { %v761_v31 = vmul.bf16 1069105081, %v746_v26  ;;  %v720_v33 = vpop.f32.mrb[10].mxu0  ;;  %v719_v36 = vadd.f32 %v718_v30, %v2127_v57 }
 0x206   : > { %1540 = vpow.bf16 %v758_v28  ;;  %v721_v29 = vadd.f32 %v720_v33, %v575_v55  ;;  %v722_v35 = vpop.f32.mrb[11].mxu0 }
 0x207   : > { %1542 = vpow.bf16 %v761_v31  ;;  %v723_v38 = vadd.f32 %v722_v35, %v2127_v57 }
 0x208   : > { %v2151_v39 = vpack.c.bf16 %v721_v29, %v717_v34 }
 0x209   : > { %v1537_v40 = vpop.eup %1536  ;;  %v2153_v41 = vpack.c.bf16 %v723_v38, %v719_v36 }
 0x20a   : > { %v1539_v32 = vpop.eup %1538  ;;  %v747_v23 = vmin.bf16 %v1782_v6, %v2151_v39  ;;  %v775_v37 = vadd.bf16 1073758208, %v1537_v40 }
 0x20b   : > { %v748_v42 = vmin.bf16 %v1782_v6, %v2153_v41  ;;  %v726_v43 = vpop.f32.mrb[12].mxu0  ;;  %v776_v44 = vadd.bf16 1073758208, %v1539_v32 }
 0x20c   : > { %v764_v45 = vmul.bf16 1069105081, %v747_v23  ;;  %v728_v46 = vpop.f32.mrb[13].mxu0  ;;  %v783_v47 = vmul.bf16 %v1537_v40, %v775_v37  ;;  %v727_v53 = vadd.f32 %v726_v43, %v575_v55 }
 0x20d   : > { %v767_v49 = vmul.bf16 1069105081, %v748_v42  ;;  %v730_v50 = vpop.f32.mrb[14].mxu0  ;;  %v784_v51 = vmul.bf16 %v1539_v32, %v776_v44  ;;  %v729_v59 = vadd.f32 %v728_v46, %v2127_v57 }
 0x20e   : > { %1544 = vpow.bf16 %v764_v45  ;;  %v731_v54 = vadd.f32 %v730_v50, %v575_v55  ;;  %v732_v56 = vpop.f32.mrb[15].mxu0  ;;  %v791_v58 = vadd.bf16 1073758208, %v783_v47 }
 0x20f   : > { %1546 = vpow.bf16 %v767_v49  ;;  %v733_v48 = vadd.f32 %v732_v56, %v2127_v57  ;;  %v792_v60 = vadd.bf16 1073758208, %v784_v51 }
 0x210   : > { %v2161_v61 = vpack.c.bf16 %v731_v54, %v727_v53  ;;  %1548 = vrcp.bf16 %v791_v58 }
 0x211   : > { %v1541_v62 = vpop.eup %1540  ;;  %v2163_v2 = vpack.c.bf16 %v733_v48, %v729_v59  ;;  %1550 = vrcp.bf16 %v792_v60 }
 0x212   : > { %v1543_v7 = vpop.eup %1542  ;;  %v749_v10 = vmin.bf16 %v1782_v6, %v2161_v61  ;;  %v777_v55 = vadd.bf16 1073758208, %v1541_v62 }
 0x213   : > { %v750_v12 = vmin.bf16 %v1782_v6, %v2163_v2  ;;  %v778_v13 = vadd.bf16 1073758208, %v1543_v7 }
 0x214   : > { %v770_v14 = vmul.bf16 1069105081, %v749_v10  ;;  %v785_v15 = vmul.bf16 %v1541_v62, %v777_v55 }
 0x215   : > { %v773_v57 = vmul.bf16 1069105081, %v750_v12  ;;  %v786_v17 = vmul.bf16 %v1543_v7, %v778_v13 }
 0x216   : > { %1552 = vpow.bf16 %v770_v14  ;;  %v793_v19 = vadd.bf16 1073758208, %v785_v15 }
 0x217   : > { %1554 = vpow.bf16 %v773_v57  ;;  %v794_v63 = vadd.bf16 1073758208, %v786_v17 }
 0x218   : > { %1556 = vrcp.bf16 %v793_v19 }
 0x219   : > { %v1545_v20 = vpop.eup %1544  ;;  %1558 = vrcp.bf16 %v794_v63 }
 0x21a   : > { %v1547_v21 = vpop.eup %1546  ;;  %v779_v22 = vadd.bf16 1073758208, %v1545_v20 }
 0x21b   : > { %v1549_v11 = vpop.eup %1548  ;;  %v780_v26 = vadd.bf16 1073758208, %v1547_v21 }
 0x21c   : > { %v1551_v27 = vpop.eup %1550  ;;  %v800_v28 = vmul.bf16 %v1549_v11, %v783_v47  ;;  %v787_v30 = vmul.bf16 %v1545_v20, %v779_v22 }
 0x21d   : > { %v802_v6 = vmul.bf16 %v1551_v27, %v784_v51  ;;  %v788_v31 = vmul.bf16 %v1547_v21, %v780_v26 }
 0x21e   : > { %v795_v33 = vadd.bf16 1073758208, %v787_v30  ;;  %v815_v35 = vmul.bf16 %v800_v28, %v2131_v52 }
 0x21f   : > { %v816_v34 = vmul.bf16 %v802_v6, %v2133_v3  ;;  %v796_v29 = vadd.bf16 1073758208, %v788_v31 }
 0x220   : > { %1560 = vrcp.bf16 %v795_v33 }
 0x221   : > { %v1553_v36 = vpop.eup %1552  ;;  %991 = vmatprep.mubr.bf16.mxu1 %v816_v34  ;;  %1562 = vrcp.bf16 %v796_v29 }
 0x222   : > { %v1555_v38 = vpop.eup %1554  ;;  %992 = vmatmul.mubr.bf16.vlgmr.msra.gmra.mrb[0].mxu1 %v815_v35  ;;  %v781_v40 = vadd.bf16 1073758208, %v1553_v36 }
 0x223   : > { %v1557_v32 = vpop.eup %1556  ;;  %v782_v23 = vadd.bf16 1073758208, %v1555_v38 }
 0x224   : > { %v1559_v37 = vpop.eup %1558  ;;  %v804_v42 = vmul.bf16 %v1557_v32, %v785_v15  ;;  %v789_v43 = vmul.bf16 %v1553_v36, %v781_v40 }
 0x225   : > { %v806_v44 = vmul.bf16 %v1559_v37, %v786_v17  ;;  %v790_v45 = vmul.bf16 %v1555_v38, %v782_v23 }
 0x226   : > { %v797_v46 = vadd.bf16 1073758208, %v789_v43  ;;  %v817_v52 = vmul.bf16 %v804_v42, %v2141_v24 }
 0x227   : > { %v818_v3 = vmul.bf16 %v806_v44, %v2143_v25  ;;  %v798_v47 = vadd.bf16 1073758208, %v790_v45 }
 0x228   : > { %1564 = vrcp.bf16 %v797_v46 }
 0x229   : > { %999 = vmatprep.mubr.bf16.mxu1 %v818_v3  ;;  %1566 = vrcp.bf16 %v798_v47 }
 0x22a   : > { %1000 = vmatmul.mubr.bf16.gmra.mrb[4].mxu1 %v817_v52 }
 0x22b   : > { %v1561_v49 = vpop.eup %1560 }
 0x22c   : > { %v1563_v50 = vpop.eup %1562  ;;  %v808_v51 = vmul.bf16 %v1561_v49, %v787_v30 }
 0x22d   : > { %v810_v53 = vmul.bf16 %v1563_v50, %v788_v31 }
 0x22e   : > { %v819_v56 = vmul.bf16 %v808_v51, %v2151_v39 }
 0x22f   : > { %v820_v54 = vmul.bf16 %v810_v53, %v2153_v41  ;;  %v2180_v41 = vld [vmem:[%s2303_s6] ss:$0 sm:$0xff] }
 0x231   : > { %1007 = vmatprep.mubr.bf16.mxu1 %v820_v54 }
 0x232   : > { %1008 = vmatmul.mubr.bf16.gmra.mrb[8].mxu1 %v819_v56 }
 0x233   : > { %v1565_v58 = vpop.eup %1564 }
 0x234   : > { %v1567_v59 = vpop.eup %1566  ;;  %v812_v25 = vmul.bf16 %v1565_v58, %v789_v43 }
 0x235   : > { %v814_v48 = vmul.bf16 %v1567_v59, %v790_v45 }
 0x236   : > { %v821_v60 = vmul.bf16 %v812_v25, %v2161_v61 }
 0x237   : > { %v822_v24 = vmul.bf16 %v814_v48, %v2163_v2 }
 0x239   : > { %1015 = vmatprep.mubr.bf16.mxu1 %v822_v24 }
 0x23a   : > { %1016 = vmatmul.mubr.bf16.gmra.mrb[12].mxu1 %v821_v60 }
 0x2f5   : > { %v1365_v62 = vpop.f32.mrb[0].mxu1 }
 0x2f6   : > { %v1366_v7 = vpop.f32.mrb[1].mxu1 }
 0x2f7   : > { %v1367_v39 = vadd.f32 %v1366_v7, %v1365_v62  ;;  %v1368_v10 = vpop.f32.mrb[2].mxu1 }
 0x2f8   : > { %v1369_v55 = vpop.f32.mrb[3].mxu1 }
 0x2f9   : > { %v1058_v12 = vadd.f32 %v1367_v39, %v2180_v41  ;;  %v1370_v13 = vadd.f32 %v1369_v55, %v1368_v10 }
 0x2fb   : > { %v2184_v14 = vadd.f32 %v1058_v12, %v2029_v0  ;;  %v1059_v61 = vadd.f32 %v1370_v13, %v2180_v41 }
 0x2fd   : > { %v1082_v2 = vmin.f32 %v2184_v14, 20.0  ;;  %v2189_v15 = vadd.f32 %v1059_v61, %v2032_v1  ;;  %v1371_v57 = vpop.f32.mrb[4].mxu1 }
 0x2fe   : > { %v1372_v17 = vpop.f32.mrb[5].mxu1 }
 0x2ff   : > { %v1090_v19 = vmul.f32 1.442695, %v1082_v2  ;;  %v1083_v63 = vmin.f32 %v2189_v15, 20.0  ;;  %v1373_v20 = vadd.f32 %v1372_v17, %v1371_v57  ;;  %v1374_v21 = vpop.f32.mrb[6].mxu1 }
 0x300   : > { %v1375_v22 = vpop.f32.mrb[7].mxu1 }
 0x301   : > { %1568 = vpow2.f32 %v1090_v19  ;;  %v1092_v11 = vmul.f32 1.442695, %v1083_v63  ;;  %v1060_v0 = vadd.f32 %v1373_v20, %v2180_v41  ;;  %v1376_v26 = vadd.f32 %v1375_v22, %v1374_v21 }
 0x303   : > { %1570 = vpow2.f32 %v1092_v11  ;;  %v2194_v27 = vadd.f32 %v1060_v0, %v2040_v4  ;;  %v1061_v1 = vadd.f32 %v1376_v26, %v2180_v41 }
 0x305   : > { %v1084_v28 = vmin.f32 %v2194_v27, 20.0  ;;  %v2199_v30 = vadd.f32 %v1061_v1, %v2044_v5  ;;  %v1377_v6 = vpop.f32.mrb[8].mxu1 }
 0x306   : > { %v1378_v31 = vpop.f32.mrb[9].mxu1 }
 0x307   : > { %v1094_v33 = vmul.f32 1.442695, %v1084_v28  ;;  %v1085_v34 = vmin.f32 %v2199_v30, 20.0  ;;  %v1379_v29 = vadd.f32 %v1378_v31, %v1377_v6  ;;  %v1380_v35 = vpop.f32.mrb[10].mxu1 }
 0x308   : > { %v1381_v36 = vpop.f32.mrb[11].mxu1 }
 0x309   : > { %1572 = vpow2.f32 %v1094_v33  ;;  %v1096_v38 = vmul.f32 1.442695, %v1085_v34  ;;  %v1062_v4 = vadd.f32 %v1379_v29, %v2180_v41  ;;  %v1382_v40 = vadd.f32 %v1381_v36, %v1380_v35 }
 0x30b   : > { %v1569_v32 = vpop.eup %1568  ;;  %1574 = vpow2.f32 %v1096_v38  ;;  %v2204_v23 = vadd.f32 %v1062_v4, %v2053_v8  ;;  %v1063_v5 = vadd.f32 %v1382_v40, %v2180_v41 }
 0x30c   : > { %v1106_v37 = vadd.f32 2.0, %v1569_v32 }
 0x30d   : > { %v1571_v42 = vpop.eup %1570  ;;  %v1086_v43 = vmin.f32 %v2204_v23, 20.0  ;;  %v2209_v44 = vadd.f32 %v1063_v5, %v2056_v9  ;;  %v1383_v45 = vpop.f32.mrb[12].mxu1 }
 0x30e   : > { %v1114_v46 = vmul.f32 %v1569_v32, %v1106_v37  ;;  %v1107_v3 = vadd.f32 2.0, %v1571_v42  ;;  %v1384_v47 = vpop.f32.mrb[13].mxu1 }
 0x30f   : > { %v1098_v52 = vmul.f32 1.442695, %v1086_v43  ;;  %v1087_v49 = vmin.f32 %v2209_v44, 20.0  ;;  %v1385_v50 = vadd.f32 %v1384_v47, %v1383_v45  ;;  %v1386_v51 = vpop.f32.mrb[14].mxu1 }
 0x310   : > { %v1130_v8 = vadd.f32 2.0, %v1114_v46  ;;  %v1115_v53 = vmul.f32 %v1571_v42, %v1107_v3  ;;  %v1387_v54 = vpop.f32.mrb[15].mxu1  ;;  %v1122_v17 = vmul.f32 %v1114_v46, %v2184_v14 }
 0x311   : > { %1576 = vpow2.f32 %v1098_v52  ;;  %v1100_v56 = vmul.f32 1.442695, %v1087_v49  ;;  %v1064_v58 = vadd.f32 %v1385_v50, %v2180_v41  ;;  %v1388_v59 = vadd.f32 %v1387_v54, %v1386_v51 }
 0x312   : > { %1578 = vrcp.f32 %v1130_v8  ;;  %v1131_v9 = vadd.f32 2.0, %v1115_v53  ;;  %v1123_v21 = vmul.f32 %v1115_v53, %v2189_v15 }
 0x313   : > { %v1573_v25 = vpop.eup %1572  ;;  %1580 = vpow2.f32 %v1100_v56  ;;  %v2214_v48 = vadd.f32 %v1064_v58, %v2065_v16  ;;  %v1065_v24 = vadd.f32 %v1388_v59, %v2180_v41 }
 0x314   : > { %1582 = vrcp.f32 %v1131_v9  ;;  %v1108_v60 = vadd.f32 2.0, %v1573_v25 }
 0x315   : > { %v1575_v62 = vpop.eup %1574  ;;  %v1088_v7 = vmin.f32 %v2214_v48, 20.0  ;;  %v2219_v39 = vadd.f32 %v1065_v24, %v2068_v18 }
 0x316   : > { %v1116_v10 = vmul.f32 %v1573_v25, %v1108_v60  ;;  %v1109_v55 = vadd.f32 2.0, %v1575_v62 }
 0x317   : > { %v1102_v12 = vmul.f32 1.442695, %v1088_v7  ;;  %v1089_v13 = vmin.f32 %v2219_v39, 20.0 }
 0x318   : > { %v1132_v61 = vadd.f32 2.0, %v1116_v10  ;;  %v1117_v2 = vmul.f32 %v1575_v62, %v1109_v55  ;;  %v1124_v15 = vmul.f32 %v1116_v10, %v2194_v27 }
 0x319   : > { %1584 = vpow2.f32 %v1102_v12  ;;  %v1104_v16 = vmul.f32 1.442695, %v1089_v13 }
 0x31a   : > { %1586 = vrcp.f32 %v1132_v61  ;;  %v1133_v41 = vadd.f32 2.0, %v1117_v2  ;;  %v1125_v35 = vmul.f32 %v1117_v2, %v2199_v30 }
 0x31b   : > { %v1577_v57 = vpop.eup %1576  ;;  %1588 = vpow2.f32 %v1104_v16 }
 0x31c   : > { %v1579_v19 = vpop.eup %1578  ;;  %1590 = vrcp.f32 %v1133_v41  ;;  %v1110_v18 = vadd.f32 2.0, %v1577_v57 }
 0x31d   : > { %v1581_v63 = vpop.eup %1580  ;;  %v1146_v20 = vmul.f32 %v1579_v19, %v1122_v17 }
 0x31e   : > { %v1583_v22 = vpop.eup %1582  ;;  %v1118_v11 = vmul.f32 %v1577_v57, %v1110_v18  ;;  %v1111_v0 = vadd.f32 2.0, %v1581_v63 }
 0x31f   : > { %1154 = vst [vmem:[%s2226_s14] sm:$0xff] %v1146_v20  ;;  %v1147_v26 = vmul.f32 %v1583_v22, %v1123_v21 }
 0x320   : > { %v1134_v1 = vadd.f32 2.0, %v1118_v11  ;;  %v1119_v14 = vmul.f32 %v1581_v63, %v1111_v0  ;;  %v1126_v37 = vmul.f32 %v1118_v11, %v2204_v23 }
 0x321   : > { %1155 = vst [vmem:[%s2226_s14 + $0x8] sm:$0xff] %v1147_v26 }
 0x322   : > { %1592 = vrcp.f32 %v1134_v1  ;;  %v1135_v28 = vadd.f32 2.0, %v1119_v14  ;;  %v1127_v43 = vmul.f32 %v1119_v14, %v2209_v44 }
 0x323   : > { %v1585_v6 = vpop.eup %1584 }
 0x324   : > { %v1587_v31 = vpop.eup %1586  ;;  %1594 = vrcp.f32 %v1135_v28  ;;  %v1112_v33 = vadd.f32 2.0, %v1585_v6 }
 0x325   : > { %v1589_v34 = vpop.eup %1588  ;;  %v1148_v29 = vmul.f32 %v1587_v31, %v1124_v15 }
 0x326   : > { %v1591_v36 = vpop.eup %1590  ;;  %v1120_v38 = vmul.f32 %v1585_v6, %v1112_v33  ;;  %v1113_v4 = vadd.f32 2.0, %v1589_v34 }
 0x327   : > { %1156 = vst [vmem:[%s2226_s14 + $0x10] sm:$0xff] %v1148_v29  ;;  %v1149_v40 = vmul.f32 %v1591_v36, %v1125_v35 }
 0x328   : > { %v1136_v32 = vadd.f32 2.0, %v1120_v38  ;;  %v1121_v5 = vmul.f32 %v1589_v34, %v1113_v4  ;;  %v1128_v3 = vmul.f32 %v1120_v38, %v2214_v48 }
 0x329   : > { %1157 = vst [vmem:[%s2226_s14 + $0x18] sm:$0xff] %v1149_v40 }
 0x32a   : > { %1596 = vrcp.f32 %v1136_v32  ;;  %v1137_v27 = vadd.f32 2.0, %v1121_v5  ;;  %v1129_v23 = vmul.f32 %v1121_v5, %v2219_v39 }
 0x32c   : > { %v1593_v42 = vpop.eup %1592  ;;  %1598 = vrcp.f32 %v1137_v27 }
 0x32d   : > { %v1150_v30 = vmul.f32 %v1593_v42, %v1126_v37 }
 0x32e   : > { %v1595_v45 = vpop.eup %1594 }
 0x32f   : > { %1158 = vst [vmem:[%s2226_s14 + $0x20] sm:$0xff] %v1150_v30  ;;  %v1151_v46 = vmul.f32 %v1595_v45, %v1127_v43 }
 0x331   : > { %1159 = vst [vmem:[%s2226_s14 + $0x28] sm:$0xff] %v1151_v46 }
 0x334   : > { %v1597_v47 = vpop.eup %1596 }
 0x335   : > { %v1152_v52 = vmul.f32 %v1597_v47, %v1128_v3 }
 0x336   : > { %v1599_v49 = vpop.eup %1598 }
 0x337   : > { %1160 = vst [vmem:[%s2226_s14 + $0x30] sm:$0xff] %v1152_v52  ;;  %v1153_v44 = vmul.f32 %v1599_v49, %v1129_v23 }
 0x339   : > { %1161 = vst [vmem:[%s2226_s14 + $0x38] sm:$0xff] %v1153_v44 }
 0x33a   : > { %1699 = shalt.err (!%p1696_p5)
}
 0x33b   : > { %s1700_s20 = scalar_lea.hbm %s2245_s17, 1024  ;;  %s1704_s18 = scalar_lea.hbm %s2304_s7, 4096 }
 0x33c   : > { %p1701_p9 = scmp.ne.s32.totalorder %s2245_s17, %s1700_s20  ;;  %p1705_p3 = scmp.lt.u32.totalorder %s2245_s17, %s2304_s7 }
 0x33d   : > { %p1706_p7 = scmp.lt.u32.totalorder %s1704_s18, %s1700_s20  ;;  %p1708_p2 = scmp.lt.u32.totalorder %s1700_s20, %s2245_s17 }
 0x33e   : > { %p1702_p12 = pnand %p1701_p9, %p1954_p11 }
 0x33f   : > { %p1707_p10 = por %p1706_p7, %p1705_p3 }
 0x340   : > { %p1703_p1 = pneg %p1702_p12 }
 0x341   : > { %p1709_p4 = por %p1708_p2, %p1707_p10 }
 0x343   : > { %p1710_p6 = pnand %p1709_p4, %p1703_p1 }
 0x345   : > { %1713 = shalt.err (!%p1710_p6)
}
 0x346   : > { %s1784_s10 = smov 128   ;;  %s1785_s8 = smov 8  }
 0x347   : > { %1399 = dma.vmem_to_hbm [thread:$0]  (%p1954_p11), %s2247_s16, 1024, %s2245_s17, %s1163_s27, %s1784_s10, %s1784_s10, %s1785_s8  }
 0x348 PF: > { %s2327_s9 = sld [smem:[#allocation14_spill]]  ;;  %s2328_s11 = sld [smem:[#allocation15_spill]] }
 0x349   : > { %p1421_p8 = scmp.ge.s32.totalorder %s1772_s29, 2 }
 0x34e   : > { %s1191_s13 = sand.u32 1, %s2327_s9   ;;  %p2329_p13 = scmp.ne.s32.totalorder %s2328_s11, 0 }
 0x34f   : > { %s1192_s19 = scalar_lea.sflag [#allocation6], %s1191_s13 }
 0x350   : > { %p1413_p0 = pnand %p1421_p8, %p2329_p13 }
 0x352   : > { %1747 = dma.done.wait (!%p1413_p0), %s1192_s19, 1024  }
 0x353   : > { %1749 = vsyncadd (!%p1413_p0), %s1192_s19, 4294966272  ;;  %s24_s29 = sadd.s32 1, %s1772_s29   ;;  %s2330_s24 = smov %s1756_s25 }
 0x354   : > { %p21_p5 = scmp.ge.s32.totalorder %s24_s29, 6   ;;  %s2331_s25 = smov %s1760_s26 }
 0x355   : > { %s2332_s26 = smov %s1963_s15  ;;  %s2333_s27 = smov %s1768_s28 }
 0x356   : > { %s2334_s28 = smov %s2336_s22  ;;  %23 = sbr.rel (!%p21_p5) target bundleno = 7 (0x7), region = 114 }
 0x35d   :  { %1197 = vsyncpa [#allocation5], 1 }
 0x35e   :  { %1199 = vsyncpa [#allocation5 + $0x1], 1 }
 0x35f   :  { %1200 = vsyncpa [#allocation8], 1 }
 0x360   :  { %1201 = vsyncpa [#allocation6], 1 }
 0x361   :  { %1203 = vsyncpa [#allocation6 + $0x1], 1 }

// kernel: tpu_custom_call.1
= control target key start
LH: loop header
LB: loop body
LE: loop exit
PB: predicated region body
PF: predicated region fallthrough
CT: control target
= control target key end

     0   :  { %12 = vsyncpa [#allocation5], 0  ;;  %s2297_s0 = inlined_call_operand.hbm [shape: f32[256,128], index: 0, kind: input, shape index: {}]   ;;  %s2298_s1 = inlined_call_operand.vmem [shape: f32[1,128], index: 1, kind: input, shape index: {}]   ;;  %s2299_s2 = inlined_call_operand.vmem [shape: f32[1,128], index: 2, kind: input, shape index: {}]   ;;  %s2300_s3 = inlined_call_operand.hbm [shape: bf16[128,256], index: 3, kind: input, shape index: {}]   ;;  %s2301_s4 = inlined_call_operand.vmem [shape: f32[1,256], index: 4, kind: input, shape index: {}]   ;;  %s2302_s5 = inlined_call_operand.hbm [shape: bf16[256,128], index: 5, kind: input, shape index: {}]   ;;  %s2303_s6 = inlined_call_operand.vmem [shape: f32[1,128], index: 6, kind: input, shape index: {}]   ;;  %s2304_s7 = inlined_call_operand.hbm [shape: f32[256,128], index: 7, kind: output, shape index: {}]  }
   0x1   :  { %14 = vsyncpa [#allocation5 + $0x1], 0 }
   0x2   :  { %15 = vsyncpa [#allocation8], 0 }
   0x3   :  { %16 = vsyncpa [#allocation6], 0 }
   0x4   :  { %18 = vsyncpa [#allocation6 + $0x1], 0  ;;  %s1826_s24 = smov 0   ;;  %s1828_s25 = smov 0  }
   0x5   :  { %s1830_s26 = smov 0   ;;  %s1832_s27 = smov 0  }
   0x6   :  { %s1834_s28 = smov 0   ;;  %s1836_s29 = smov 0  }
   0x7 LB: > { %2312 = sst [smem:[#allocation14_spill]] %s1752_s24  ;;  %s1292_s30 = sadd.s32 4294967295, %s1772_s29   ;;  %s1772_s29 = sphi %s1836_s29, %s24_s29   ;;  %s1768_s28 = sphi %s1834_s28, %s2334_s28   ;;  %s1764_s27 = sphi %s1832_s27, %s2333_s27   ;;  %s1760_s26 = sphi %s1830_s26, %s2332_s26   ;;  %s1756_s25 = sphi %s1828_s25, %s2331_s25   ;;  %s1752_s24 = sphi %s1826_s24, %s2330_s24  }
   0x8   : > { %s1293_s8 = sadd.s32 4294967294, %s1772_s29   ;;  %p56_p0 = scmp.ne.s32.totalorder %s1756_s25, %s1752_s24 }
   0x9   : > { %p1860_p1 = scmp.eq.s32.totalorder %s1292_s30, 0  ;;  %p1864_p2 = scmp.eq.s32.totalorder %s1292_s30, 3 }
   0xa   : > { %p227_p3 = scmp.eq.s32.totalorder %s1293_s8, 3  ;;  %p1294_p5 = scmp.ge.s32.totalorder %s1772_s29, 1 }
   0xb   : > { %s2313_s9 = scalar_select %p1860_p1, 1, 0 }
   0xc   : > { %s2314_s10 = scalar_select %p1864_p2, 1, 0 }
   0xd   : > { %p1870_p4 = por %p1860_p1, %p56_p0  ;;  %p1875_p6 = por %p227_p3, %p56_p0 }
   0xe   : > { %p234_p7 = scmp.lt.s32.totalorder %s1772_s29, 5  ;;  %s1774_s14 = smov [#allocation7]  }
   0xf   : > { %s2315_s11 = scalar_select %p1870_p4, 1, 0 }
  0x10   : > { %s2316_s12 = scalar_select %p1875_p6, 1, 0 }
  0x11   : > { %p1880_p8 = pnand %p1294_p5, %p234_p7  ;;  %s255_s15 = sshll.u32 %s1774_s14, 4  ;;  %s256_s15 = int_to_ptr.vmem [resolvable:$true] %s255_s15 }
  0x12   : > { %2317 = sst [smem:[#allocation15_spill]] %s2316_s12  ;;  %s1775_s17 = smov [#allocation9]  }
  0x13   : > { %s2318_s13 = scalar_select %p1880_p8, 1, 0 }
  0x14   : > { %p1401_p9 = pneg %p1880_p8  ;;  %s279_s18 = sshll.u32 %s1775_s17, 4  ;;  %s1892_s18 = int_to_ptr.vmem [resolvable:$true] %s279_s18 }
  0x15   : > { %s1600_s21 = scalar_lea.hbm %s2300_s3, 2048 }
  0x16   : > { %p1888_p10 = pnand %p1401_p9, %p1860_p1  ;;  %p1601_p11 = scmp.ne.s32.totalorder %s2300_s3, %s1600_s21 }
  0x17   : > { %p1607_p3 = scmp.lt.u32.totalorder %s1600_s21, %s2300_s3 }
  0x18   : > { %p1602_p12 = pneg %p1888_p10 }
  0x1a   : > { %p1603_p13 = pnand %p1602_p12, %p1601_p11 }
  0x1c   : > { %p1604_p0 = pneg %p1603_p13 }
  0x1e   : > { %p1609_p5 = pnand %p1607_p3, %p1604_p0 }
  0x20   : > { %1612 = shalt.err (!%p1609_p5)
}
  0x21   : > { %s1613_s14 = scalar_lea.vmem %s256_s15, 2048  ;;  %p1621_p1 = scmp.lt.s32.totalorder %s256_s15, %s256_s15 }
  0x22   : > { %p1614_p7 = scmp.ne.s32.totalorder %s256_s15, %s1613_s14  ;;  %p1622_p4 = scmp.lt.s32.totalorder %s1613_s14, %s1613_s14 }
  0x24   : > { %p1616_p9 = pnand %p1614_p7, %p1602_p12  ;;  %p1623_p8 = por %p1622_p4, %p1621_p1 }
  0x26   : > { %p1617_p6 = pneg %p1616_p9 }
  0x28   : > { %p1624_p2 = pnand %p1623_p8, %p1617_p6 }
  0x2a   : > { %1627 = shalt.err (!%p1624_p2)
}
  0x2b   : > { %s2311_s17 = smov 128   ;;  %s1777_s19 = smov 8  }
  0x2c   : > { %1404 = dma.hbm_to_vmem [thread:$0]  (!%p1888_p10), %s2300_s3, 2048, %s256_s15, [#allocation8], %s2311_s17, %s2311_s17, %s1777_s19  }
  0x2d   : > { %s1628_s30 = scalar_lea.hbm %s2302_s5, 2048 }
  0x2e   : > { %p1629_p1 = scmp.ne.s32.totalorder %s2302_s5, %s1628_s30  ;;  %p1635_p6 = scmp.lt.u32.totalorder %s1628_s30, %s2302_s5 }
  0x30   : > { %p1631_p2 = pnand %p1629_p1, %p1602_p12 }
  0x32   : > { %p1632_p4 = pneg %p1631_p2 }
  0x34   : > { %p1637_p8 = pnand %p1635_p6, %p1632_p4 }
  0x36   : > { %1640 = shalt.err (!%p1637_p8)
}
  0x37   : > { %s1641_s15 = scalar_lea.vmem %s1892_s18, 2048  ;;  %p1649_p3 = scmp.lt.s32.totalorder %s1892_s18, %s1892_s18 }
  0x38   : > { %p1642_p11 = scmp.ne.s32.totalorder %s1892_s18, %s1641_s15  ;;  %p1650_p5 = scmp.lt.s32.totalorder %s1641_s15, %s1641_s15 }
  0x3a   : > { %p1644_p13 = pnand %p1642_p11, %p1602_p12  ;;  %p1651_p7 = por %p1650_p5, %p1649_p3 }
  0x3c   : > { %p1645_p0 = pneg %p1644_p13 }
  0x3e   : > { %p1652_p9 = pnand %p1651_p7, %p1645_p0 }
  0x40   : > { %1655 = shalt.err (!%p1652_p9)
}
  0x41   : > { %s1778_s24 = smov 64   ;;  %s1779_s12 = smov 4  }
  0x42   : > { %1407 = dma.hbm_to_vmem [thread:$0]  (!%p1888_p10), %s2302_s5, 2048, %s1892_s18, [#allocation8], %s1778_s24, %s1778_s24, %s1779_s12  }
  0x43   : > { %s36_s22 = sadd.s32 1, %s1768_s28  ;;  %s43_s23 = sadd.s32 1, %s1760_s26 }
  0x44   : > { %p38_p12 = scmp.ge.s32.totalorder %s36_s22, 4  ;;  %p50_p1 = scmp.ne.s32.totalorder %s1760_s26, %s1756_s25 }
  0x45   : > { %p51_p2 = scmp.eq.s32.totalorder %s1772_s29, 0  ;;  %p1418_p4 = scmp.lt.s32.totalorder %s1772_s29, 4 }
  0x46   : > { %s2336_s22 = smov (%p38_p12, %s36_s22), 0  ;;  %p2320_p8 = scmp.ne.s32.totalorder %s2314_s10, 0 }
  0x47   : > { %p52_p6 = por %p51_p2, %p50_p1  ;;  %s40_s16 = ssub.s32 %s1768_s28, %s2336_s22 }
  0x48   : > { %p1954_p11 = por %p2320_p8, %p50_p1  ;;  %s296_s8 = sand.u32 1, %s1760_s26  }
  0x49   : > { %p41_p13 = scmp.eq.s32.totalorder %s40_s16, 0  ;;  %s1299_s18 = sshll.u32 %s296_s8, 6 }
  0x4a   : > { %s1347_s14 = sshll.u32 %s1768_s28, 10  ;;  %s300_s10 = scalar_lea.vmem [#allocation4], %s1299_s18 }
  0x4b   : > { %s1963_s15 = scalar_select %p41_p13, %s1760_s26, %s43_s23  }
  0x4c   : > { %s1968_s20 = scalar_lea.hbm %s2297_s0, %s1347_s14  ;;  %s307_s21 = sshll.u32 %s300_s10, 4  ;;  %s1976_s21 = int_to_ptr.vmem [resolvable:$true] %s307_s21 }
  0x4d   : > { %p1972_p10 = pnand %p1418_p4, %p52_p6  ;;  %s1978_s23 = scalar_lea.sflag [#allocation5], %s296_s8 }
  0x4e   : > { %s1656_s16 = scalar_lea.hbm %s1968_s20, 1024  ;;  %s1661_s24 = scalar_lea.hbm %s2297_s0, 4096 }
  0x4f   : > { %p1657_p0 = scmp.ne.s32.totalorder %s1968_s20, %s1656_s16  ;;  %p1658_p3 = pneg %p1972_p10 }
  0x50   : > { %p1662_p9 = scmp.lt.u32.totalorder %s1968_s20, %s2297_s0  ;;  %p1663_p12 = scmp.lt.u32.totalorder %s1661_s24, %s1656_s16 }
  0x51   : > { %p1659_p5 = pnand %p1658_p3, %p1657_p0  ;;  %p1665_p2 = scmp.lt.u32.totalorder %s1656_s16, %s1968_s20 }
  0x52   : > { %p1664_p1 = por %p1663_p12, %p1662_p9 }
  0x53   : > { %p1660_p7 = pneg %p1659_p5 }
  0x54   : > { %p1666_p4 = por %p1665_p2, %p1664_p1 }
  0x56   : > { %p1667_p6 = pnand %p1666_p4, %p1660_p7 }
  0x58   : > { %1670 = shalt.err (!%p1667_p6)
}
  0x59   : > { %s1671_s8 = scalar_lea.vmem %s1976_s21, 1024  ;;  %s1780_s18 = smov [#allocation4]  }
  0x5a   : > { %p1672_p8 = scmp.ne.s32.totalorder %s1976_s21, %s1671_s8  ;;  %s1676_s14 = sshll.u32 %s1780_s18, 4  ;;  %s1677_s14 = int_to_ptr.vmem [resolvable:$false] %s1676_s14 }
  0x5b   : > { %s1678_s12 = scalar_lea.vmem %s1677_s14, 2048  ;;  %p1679_p5 = scmp.lt.s32.totalorder %s1976_s21, %s1677_s14 }
  0x5c   : > { %p1674_p13 = pnand %p1672_p8, %p1658_p3  ;;  %p1680_p9 = scmp.lt.s32.totalorder %s1678_s12, %s1671_s8 }
  0x5e   : > { %p1675_p0 = pneg %p1674_p13  ;;  %p1681_p12 = por %p1680_p9, %p1679_p5 }
  0x60   : > { %p1682_p1 = pnand %p1681_p12, %p1675_p0 }
  0x62   : > { %1685 = shalt.err (!%p1682_p1)
}
  0x63   : > { %s2323_s16 = smov 128   ;;  %p2324_p3 = scmp.ne.s32.totalorder %s2318_s13, 0 }
  0x64   : > { %1411 = dma.hbm_to_vmem [thread:$0]  (!%p1972_p10), %s1968_s20, 1024, %s1976_s21, %s1978_s23, %s2323_s16, %s2323_s16, %s1777_s19  }
  0x65   : > { %319 = sbr.rel (%p2324_p3) target bundleno = 840 (0x348), region = 48  ;;  %s2012_s24 = sand.u32 (!%p2324_p3), 1, %s1756_s25  }
  0x66   : > { %s1303_s10 = sshll.u32 (!%p2324_p3), %s2012_s24, 6  ;;  %s322_s8 = scalar_lea.sflag (!%p2324_p3), [#allocation5], %s2012_s24 }
  0x67   : > { %s2018_s17 = scalar_lea.vmem (!%p2324_p3), [#allocation4], %s1303_s10  ;;  %p2325_p7 = scmp.ne.s32.totalorder (!%p2324_p3), %s2315_s11, 0 }
  0x6c   : > { %1739 = dma.done.wait (%p2325_p7), %s322_s8, 1024  }
  0x6d   : > { %1741 = vsyncadd (%p2325_p7), %s322_s8, 4294966272  ;;  %p2326_p10 = scmp.ne.s32.totalorder %s2313_s9, 0 }
  0x6f   : > { %1743 = dma.done.wait (%p2326_p10), [#allocation8], 4096  }
  0x70   : > { %1745 = vsyncadd (%p2326_p10), [#allocation8], 4294963200  ;;  %v2029_v0 = vld [vmem:[%s2018_s17] sm:$0xff]  ;;  %v2032_v1 = vld [vmem:[%s2018_s17 + $0x8] sm:$0xff]  ;;  %v1781_v32 = vmov 0   ;;  %s2226_s14 = scalar_lea.vmem [#allocation10], %s1303_s10 }
  0x71   : > { %392 = vadd.xlane.f32.xlu0 %v2029_v0  ;;  %v408_v2 = vmul.f32 %v2029_v0, %v2029_v0  ;;  %v409_v3 = vmul.f32 %v2032_v1, %v2032_v1  ;;  %v2040_v4 = vld [vmem:[%s2018_s17 + $0x10] sm:$0xff]  ;;  %v2044_v5 = vld [vmem:[%s2018_s17 + $0x18] sm:$0xff]  ;;  %v2053_v8 = vld [vmem:[%s2018_s17 + $0x20] sm:$0xff]  ;;  %694 = vmatprep.mubr.bf16.mxu0 %v1781_v32  ;;  %s1348_s12 = sshll.u32 %s1764_s27, 10  ;;  %s1176_s16 = sshll.u32 %s2226_s14, 4  ;;  %s2247_s16 = int_to_ptr.vmem [resolvable:$true] %s1176_s16 }
  0x72   : > { %v410_v6 = vmul.f32 %v2040_v4, %v2040_v4  ;;  %v411_v7 = vmul.f32 %v2044_v5, %v2044_v5  ;;  %v2056_v9 = vld [vmem:[%s2018_s17 + $0x28] sm:$0xff]  ;;  %v412_v12 = vmul.f32 %v2053_v8, %v2053_v8  ;;  %v1483_v13 = vld [vmem:[#allocation7 + $0x14] ss:$8 sps:$4 sm:$0xff]   ;;  %v1485_v15 = vld [vmem:[#allocation7 + $0x10] ss:$8 sps:$4 sm:$0xff]   ;;  %s1163_s27 = scalar_lea.sflag [#allocation6], %s2012_s24 }
  0x73   : > { %416 = vadd.xlane.f32.xlu1 %v408_v2  ;;  %v1480_v10 = vld [vmem:[#allocation7 + $0x4] ss:$8 sps:$4 sm:$0xff]   ;;  %v1482_v11 = vld [vmem:[#allocation7] ss:$8 sps:$4 sm:$0xff]   ;;  %v413_v14 = vmul.f32 %v2056_v9, %v2056_v9  ;;  %v2065_v16 = vld [vmem:[%s2018_s17 + $0x30] sm:$0xff]  ;;  %s1686_s9 = scalar_lea.vmem %s2247_s16, 1024 }
  0x74   : > { %662 = vmatprep.subr.bf16.mxu0 %v1480_v10  ;;  %v1486_v17 = vld [vmem:[#allocation7 + $0x24] ss:$8 sps:$4 sm:$0xff]   ;;  %v2068_v18 = vld [vmem:[%s2018_s17 + $0x38] sm:$0xff]  ;;  %v1488_v19 = vld [vmem:[#allocation7 + $0x20] ss:$8 sps:$4 sm:$0xff]   ;;  %v414_v20 = vmul.f32 %v2065_v16, %v2065_v16  ;;  %s2245_s17 = scalar_lea.hbm %s2304_s7, %s1348_s12  ;;  %p1687_p2 = scmp.ne.s32.totalorder %s2247_s16, %s1686_s9 }
  0x75   : > { %394 = vadd.xlane.f32.xlu0 %v2032_v1  ;;  %663 = vmatpush1.bf16.msra.mxu0 %v1482_v11  ;;  %v415_v21 = vmul.f32 %v2068_v18, %v2068_v18  ;;  %v1489_v22 = vld [vmem:[#allocation7 + $0x34] ss:$8 sps:$4 sm:$0xff]   ;;  %v1491_v23 = vld [vmem:[#allocation7 + $0x30] ss:$8 sps:$4 sm:$0xff]   ;;  %v1492_v24 = vld [vmem:[#allocation7 + $0x44] ss:$8 sps:$4 sm:$0xff]  }
  0x76   : > { %664 = vmatprep.subr.bf16.mxu0 %v1483_v13  ;;  %v1494_v25 = vld [vmem:[#allocation7 + $0x40] ss:$8 sps:$4 sm:$0xff]   ;;  %v1495_v26 = vld [vmem:[#allocation7 + $0x54] ss:$8 sps:$4 sm:$0xff]   ;;  %v1497_v27 = vld [vmem:[#allocation7 + $0x50] ss:$8 sps:$4 sm:$0xff]   ;;  %p1688_p4 = pnand %p1687_p2, %p1954_p11 }
  0x77   : > { %418 = vadd.xlane.f32.xlu1 %v409_v3  ;;  %v1498_v28 = vld [vmem:[#allocation7 + $0x64] ss:$8 sps:$4 sm:$0xff]   ;;  %v1500_v29 = vld [vmem:[#allocation7 + $0x60] ss:$8 sps:$4 sm:$0xff]   ;;  %v1501_v30 = vld [vmem:[#allocation7 + $0x74] ss:$8 sps:$4 sm:$0xff]  }
  0x78   : > { %v1503_v31 = vld [vmem:[#allocation7 + $0x70] ss:$8 sps:$4 sm:$0xff]   ;;  %p1689_p6 = pneg %p1688_p4  ;;  %s1783_s11 = smov [#allocation10]  }
  0x79   : > { %396 = vadd.xlane.f32.xlu0 %v2040_v4  ;;  %665 = vmatpush1.bf16.msra.mxu0 %v1485_v15  ;;  %s1690_s13 = sshll.u32 %s1783_s11, 4  ;;  %s1691_s13 = int_to_ptr.vmem [resolvable:$false] %s1690_s13 }
  0x7a   : > { %666 = vmatprep.subr.bf16.mxu0 %v1486_v17  ;;  %s1692_s19 = scalar_lea.vmem %s1691_s13, 2048  ;;  %p1693_p8 = scmp.lt.s32.totalorder %s2247_s16, %s1691_s13 }
  0x7b   : > { %398 = vadd.xlane.f32.xlu1 %v2044_v5  ;;  %p1694_p13 = scmp.lt.s32.totalorder %s1692_s19, %s1686_s9 }
  0x7d   : > { %420 = vadd.xlane.f32.xlu0 %v410_v6  ;;  %667 = vmatpush1.bf16.msra.mxu0 %v1488_v19  ;;  %p1695_p0 = por %p1694_p13, %p1693_p8 }
  0x7e   : > { %668 = vmatprep.subr.bf16.mxu0 %v1489_v22 }
  0x7f   : > { %422 = vadd.xlane.f32.xlu1 %v411_v7  ;;  %p1696_p5 = pnand %p1695_p0, %p1689_p6 }
  0x81   : > { %400 = vadd.xlane.f32.xlu0 %v2053_v8  ;;  %669 = vmatpush1.bf16.msra.mxu0 %v1491_v23  ;;  %v2097_v23 = vld [vmem:[%s2298_s1] ss:$0 sm:$0xff] }
  0x82   : > { %670 = vmatprep.subr.bf16.mxu0 %v1492_v24 }
  0x83   : > { %402 = vadd.xlane.f32.xlu1 %v2056_v9 }
  0x85   : > { %424 = vadd.xlane.f32.xlu0 %v412_v12  ;;  %671 = vmatpush1.bf16.msra.mxu0 %v1494_v25 }
  0x86   : > { %672 = vmatprep.subr.bf16.mxu0 %v1495_v26 }
  0x87   : > { %426 = vadd.xlane.f32.xlu1 %v413_v14 }
  0x89   : > { %404 = vadd.xlane.f32.xlu0 %v2065_v16  ;;  %673 = vmatpush1.bf16.msra.mxu0 %v1497_v27 }
  0x8a   : > { %674 = vmatprep.subr.bf16.mxu0 %v1498_v28 }
  0x8b   : > { %406 = vadd.xlane.f32.xlu1 %v2068_v18 }
  0x8d   : > { %428 = vadd.xlane.f32.xlu0 %v414_v20  ;;  %675 = vmatpush1.bf16.msra.mxu0 %v1500_v29 }
  0x8e   : > { %676 = vmatprep.subr.bf16.mxu0 %v1501_v30 }
  0x8f   : > { %430 = vadd.xlane.f32.xlu1 %v415_v21 }
  0x91   : > { %677 = vmatpush1.bf16.msra.mxu0 %v1503_v31 }
  0xfe   : > { %v393_v33 = vpop.xlane.xlu0 %392 }
  0xff   : > { %v432_v34 = vmul.f32 0.0078125, %v393_v33 }
 0x100   : > { %v417_v35 = vpop.xlane.xlu1 %416 }
 0x101   : > { %v448_v36 = vmul.f32 %v432_v34, %v432_v34  ;;  %v440_v37 = vmul.f32 0.0078125, %v417_v35  ;;  %v472_v10 = vsub.f32 %v2029_v0, %v432_v34 }
 0x102   : > { %v395_v38 = vpop.xlane.xlu0 %394 }
 0x103   : > { %v456_v39 = vsub.f32 %v440_v37, %v448_v36  ;;  %v433_v40 = vmul.f32 0.0078125, %v395_v38  ;;  %v1308_v37 = vld [vmem:[%s2299_s2] ss:$0 sm:$0xff] }
 0x104   : > { %v419_v41 = vpop.xlane.xlu1 %418 }
 0x105   : > { %v464_v42 = vmax.f32 %v456_v39, 0.0  ;;  %v449_v43 = vmul.f32 %v433_v40, %v433_v40  ;;  %v441_v44 = vmul.f32 0.0078125, %v419_v41  ;;  %v473_v24 = vsub.f32 %v2032_v1, %v433_v40 }
 0x106   : > { %v397_v45 = vpop.xlane.xlu0 %396 }
 0x107   : > { %v480_v46 = vadd.f32 1e-05, %v464_v42  ;;  %v457_v47 = vsub.f32 %v441_v44, %v449_v43  ;;  %v2077_v48 = vmul.f32 0.0078125, %v397_v45 }
 0x108   : > { %v399_v49 = vpop.xlane.xlu1 %398 }
 0x109   : > { %1520 = vrsqrt.f32 %v480_v46  ;;  %v465_v50 = vmax.f32 %v457_v47, 0.0  ;;  %v450_v51 = vmul.f32 %v2077_v48, %v2077_v48  ;;  %v2081_v52 = vmul.f32 0.0078125, %v399_v49 }
 0x10a   : > { %v421_v53 = vpop.xlane.xlu0 %420  ;;  %v474_v43 = vsub.f32 %v2040_v4, %v2077_v48 }
 0x10b   : > { %v481_v54 = vadd.f32 1e-05, %v465_v50  ;;  %v442_v55 = vmul.f32 0.0078125, %v421_v53  ;;  %v451_v57 = vmul.f32 %v2081_v52, %v2081_v52  ;;  %v475_v53 = vsub.f32 %v2044_v5, %v2081_v52 }
 0x10c   : > { %v423_v56 = vpop.xlane.xlu1 %422 }
 0x10d   : > { %1522 = vrsqrt.f32 %v481_v54  ;;  %v458_v58 = vsub.f32 %v442_v55, %v450_v51  ;;  %v443_v59 = vmul.f32 0.0078125, %v423_v56 }
 0x10e   : > { %v401_v60 = vpop.xlane.xlu0 %400 }
 0x10f   : > { %v466_v61 = vmax.f32 %v458_v58, 0.0  ;;  %v459_v62 = vsub.f32 %v443_v59, %v451_v57  ;;  %v2085_v63 = vmul.f32 0.0078125, %v401_v60 }
 0x110   : > { %v403_v2 = vpop.xlane.xlu1 %402 }
 0x111   : > { %v482_v3 = vadd.f32 1e-05, %v466_v61  ;;  %v467_v6 = vmax.f32 %v459_v62, 0.0  ;;  %v452_v7 = vmul.f32 %v2085_v63, %v2085_v63  ;;  %v2090_v11 = vmul.f32 0.0078125, %v403_v2 }
 0x112   : > { %v425_v12 = vpop.xlane.xlu0 %424  ;;  %v476_v52 = vsub.f32 %v2053_v8, %v2085_v63 }
 0x113   : > { %v1521_v13 = vpop.eup %1520  ;;  %1524 = vrsqrt.f32 %v482_v3  ;;  %v483_v14 = vadd.f32 1e-05, %v467_v6  ;;  %v444_v15 = vmul.f32 0.0078125, %v425_v12  ;;  %v453_v20 = vmul.f32 %v2090_v11, %v2090_v11 }
 0x114   : > { %v427_v17 = vpop.xlane.xlu1 %426  ;;  %v496_v19 = vmul.f32 %v1521_v13, %v472_v10  ;;  %v477_v10 = vsub.f32 %v2056_v9, %v2090_v11 }
 0x115   : > { %1526 = vrsqrt.f32 %v483_v14  ;;  %v460_v21 = vsub.f32 %v444_v15, %v452_v7  ;;  %v445_v22 = vmul.f32 0.0078125, %v427_v17 }
 0x116   : > { %v405_v25 = vpop.xlane.xlu0 %404  ;;  %v511_v33 = vmul.f32 %v2097_v23, %v496_v19 }
 0x117   : > { %v1523_v26 = vpop.eup %1522  ;;  %v468_v27 = vmax.f32 %v460_v21, 0.0  ;;  %v461_v28 = vsub.f32 %v445_v22, %v453_v20  ;;  %v438_v29 = vmul.f32 0.0078125, %v405_v25 }
 0x118   : > { %v407_v30 = vpop.xlane.xlu1 %406  ;;  %v497_v31 = vmul.f32 %v1523_v26, %v473_v24  ;;  %v526_v45 = vadd.f32 %v1308_v37, %v511_v33 }
 0x119   : > { %v484_v34 = vadd.f32 1e-05, %v468_v27  ;;  %v469_v35 = vmax.f32 %v461_v28, 0.0  ;;  %v454_v36 = vmul.f32 %v438_v29, %v438_v29  ;;  %v439_v38 = vmul.f32 0.0078125, %v407_v30 }
 0x11a   : > { %v429_v39 = vpop.xlane.xlu0 %428  ;;  %v512_v40 = vmul.f32 %v2097_v23, %v497_v31  ;;  %v478_v63 = vsub.f32 %v2065_v16, %v438_v29  ;;  %v1504_v29 = vld [vmem:[#allocation9 + $0x40] sm:$0xff]  }
 0x11b   : > { %1528 = vrsqrt.f32 %v484_v34  ;;  %v485_v41 = vadd.f32 1e-05, %v469_v35  ;;  %v446_v42 = vmul.f32 0.0078125, %v429_v39  ;;  %v455_v49 = vmul.f32 %v439_v38, %v439_v38  ;;  %v1505_v35 = vld [vmem:[#allocation9] sm:$0xff]   ;;  %1349 = vmatprep.subr.bf16.mxu1 %v1504_v29  ;;  %v1508_v39 = vld [vmem:[#allocation9 + $0x50] sm:$0xff]  }
 0x11c   : > { %v431_v44 = vpop.xlane.xlu1 %430  ;;  %v527_v46 = vadd.f32 %v1308_v37, %v512_v40  ;;  %v479_v24 = vsub.f32 %v2068_v18, %v439_v38  ;;  %1350 = vmatpush3.bf16.msra.mxu1 %v1505_v35  ;;  %v1507_v38 = vld [vmem:[#allocation9 + $0x8] sm:$0xff]   ;;  %v1509_v40 = vld [vmem:[#allocation9 + $0x10] sm:$0xff]  }
 0x11d   : > { %v1525_v47 = vpop.eup %1524  ;;  %1530 = vrsqrt.f32 %v485_v41  ;;  %v462_v50 = vsub.f32 %v446_v42, %v454_v36  ;;  %v447_v51 = vmul.f32 0.0078125, %v431_v44  ;;  %v1506_v36 = vld [vmem:[#allocation9 + $0x48] sm:$0xff]   ;;  %v1510_v41 = vld [vmem:[#allocation9 + $0x58] sm:$0xff]   ;;  %v1516_v44 = vld [vmem:[#allocation9 + $0x70] sm:$0xff]  }
 0x11e   : > { %v534_v54 = vpack.c.bf16 %v527_v46, %v526_v45  ;;  %v498_v55 = vmul.f32 %v1525_v47, %v474_v43  ;;  %1351 = vmatprep.subr.bf16.mxu1 %v1506_v36  ;;  %v1514_v42 = vld [vmem:[#allocation9 + $0x68] sm:$0xff]   ;;  %v1517_v45 = vld [vmem:[#allocation9 + $0x30] sm:$0xff]   ;;  %v1518_v46 = vld [vmem:[#allocation9 + $0x78] sm:$0xff]  }
 0x11f   : > { %v1527_v56 = vpop.eup %1526  ;;  %v470_v57 = vmax.f32 %v462_v50, 0.0  ;;  %v463_v58 = vsub.f32 %v447_v51, %v455_v49  ;;  %v1515_v43 = vld [vmem:[#allocation9 + $0x28] sm:$0xff]   ;;  %v1519_v47 = vld [vmem:[#allocation9 + $0x38] sm:$0xff]   ;;  %v572_v49 = vlaneseq }
 0x120   : > { %695 = vmatmul.mubr.bf16.vlgmr.msra.gmra.mrb[0].mxu0 %v534_v54  ;;  %v499_v59 = vmul.f32 %v1527_v56, %v475_v53  ;;  %v513_v48 = vmul.f32 %v2097_v23, %v498_v55  ;;  %1352 = vmatpush3.bf16.msra.mxu1 %v1507_v38  ;;  %v570_v53 = vld [vmem:[%s2301_s4] sm:$0x3] }
 0x121   : > { %v486_v60 = vadd.f32 1e-05, %v470_v57  ;;  %v471_v61 = vmax.f32 %v463_v58, 0.0  ;;  %704 = vmatprep.mubr.bf16.mxu0 %v1781_v32  ;;  %1353 = vmatprep.subr.bf16.mxu1 %v1508_v39  ;;  %v573_v50 = vshrl.u32 %v572_v49, 7 }
 0x122   : > { %v514_v62 = vmul.f32 %v2097_v23, %v499_v59  ;;  %v528_v3 = vadd.f32 %v1308_v37, %v513_v48 }
 0x123   : > { %1532 = vrsqrt.f32 %v486_v60  ;;  %v487_v2 = vadd.f32 1e-05, %v471_v61  ;;  %v574_v51 = vsub.s32 0, %v573_v50  ;;  %v578_v54 = vsub.s32 1, %v573_v50 }
 0x124   : > { %v529_v6 = vadd.f32 %v1308_v37, %v514_v62  ;;  %1354 = vmatpush3.bf16.msra.mxu1 %v1509_v40 }
 0x125   : > { %v1529_v7 = vpop.eup %1528  ;;  %1534 = vrsqrt.f32 %v487_v2  ;;  %1355 = vmatprep.subr.bf16.mxu1 %v1510_v41  ;;  %v575_v55 = vrot.slane %v570_v53, %v574_v51  ;;  %v2127_v57 = vrot.slane %v570_v53, %v578_v54 }
 0x126   : > { %v535_v12 = vpack.c.bf16 %v529_v6, %v528_v3  ;;  %v500_v13 = vmul.f32 %v1529_v7, %v476_v52  ;;  %v1782_v6 = vmov 1101021600  }
 0x127   : > { %v1531_v14 = vpop.eup %1530 }
 0x128   : > { %705 = vmatmul.mubr.bf16.gmra.mrb[4].mxu0 %v535_v12  ;;  %v501_v15 = vmul.f32 %v1531_v14, %v477_v10  ;;  %v515_v17 = vmul.f32 %v2097_v23, %v500_v13 }
 0x129   : > { %714 = vmatprep.mubr.bf16.mxu0 %v1781_v32 }
 0x12a   : > { %v516_v19 = vmul.f32 %v2097_v23, %v501_v15  ;;  %v530_v20 = vadd.f32 %v1308_v37, %v515_v17 }
 0x12c   : > { %v531_v21 = vadd.f32 %v1308_v37, %v516_v19 }
 0x12d   : > { %v1533_v22 = vpop.eup %1532 }
 0x12e   : > { %v536_v25 = vpack.c.bf16 %v531_v21, %v530_v20  ;;  %v502_v11 = vmul.f32 %v1533_v22, %v478_v63 }
 0x12f   : > { %v1535_v26 = vpop.eup %1534 }
 0x130   : > { %715 = vmatmul.mubr.bf16.gmra.mrb[8].mxu0 %v536_v25  ;;  %v503_v27 = vmul.f32 %v1535_v26, %v479_v24  ;;  %v517_v28 = vmul.f32 %v2097_v23, %v502_v11 }
 0x131   : > { %724 = vmatprep.mubr.bf16.mxu0 %v1781_v32  ;;  %v1511_v32 = vld [vmem:[#allocation9 + $0x18] sm:$0xff]  }
 0x132   : > { %v518_v30 = vmul.f32 %v2097_v23, %v503_v27  ;;  %v532_v31 = vadd.f32 %v1308_v37, %v517_v28  ;;  %1356 = vmatpush3.bf16.msra.mxu1 %v1511_v32  ;;  %v1512_v23 = vld [vmem:[#allocation9 + $0x60] sm:$0xff]  }
 0x133   : > { %1357 = vmatprep.subr.bf16.mxu1 %v1512_v23 }
 0x134   : > { %v533_v33 = vadd.f32 %v1308_v37, %v518_v30  ;;  %v1513_v37 = vld [vmem:[#allocation9 + $0x20] sm:$0xff]  }
 0x136   : > { %v537_v34 = vpack.c.bf16 %v533_v33, %v532_v31  ;;  %1358 = vmatpush3.bf16.msra.mxu1 %v1513_v37 }
 0x137   : > { %1359 = vmatprep.subr.bf16.mxu1 %v1514_v42 }
 0x138   : > { %725 = vmatmul.mubr.bf16.gmra.mrb[12].mxu0 %v537_v34 }
 0x13a   : > { %1360 = vmatpush3.bf16.msra.mxu1 %v1515_v43 }
 0x13b   : > { %1361 = vmatprep.subr.bf16.mxu1 %v1516_v44 }
 0x13e   : > { %1362 = vmatpush3.bf16.msra.mxu1 %v1517_v45 }
 0x13f   : > { %1363 = vmatprep.subr.bf16.mxu1 %v1518_v46 }
 0x142   : > { %1364 = vmatpush3.bf16.msra.mxu1 %v1519_v47 }
 0x1f3   : > { %v696_v56 = vpop.f32.mrb[0].mxu0 }
 0x1f4   : > { %v698_v58 = vpop.f32.mrb[1].mxu0  ;;  %v697_v48 = vadd.f32 %v696_v56, %v575_v55 }
 0x1f5   : > { %v700_v59 = vpop.f32.mrb[2].mxu0  ;;  %v699_v62 = vadd.f32 %v698_v58, %v2127_v57 }
 0x1f6   : > { %v701_v60 = vadd.f32 %v700_v59, %v575_v55  ;;  %v702_v61 = vpop.f32.mrb[3].mxu0 }
 0x1f7   : > { %v703_v2 = vadd.f32 %v702_v61, %v2127_v57 }
 0x1f8   : > { %v2131_v52 = vpack.c.bf16 %v701_v60, %v697_v48 }
 0x1f9   : > { %v2133_v3 = vpack.c.bf16 %v703_v2, %v699_v62 }
 0x1fa   : > { %v743_v7 = vmin.bf16 %v1782_v6, %v2131_v52 }
 0x1fb   : > { %v706_v10 = vpop.f32.mrb[4].mxu0  ;;  %v744_v12 = vmin.bf16 %v1782_v6, %v2133_v3 }
 0x1fc   : > { %v752_v13 = vmul.bf16 1069105081, %v743_v7  ;;  %v708_v14 = vpop.f32.mrb[5].mxu0  ;;  %v707_v19 = vadd.f32 %v706_v10, %v575_v55 }
 0x1fd   : > { %v710_v15 = vpop.f32.mrb[6].mxu0  ;;  %v755_v17 = vmul.bf16 1069105081, %v744_v12  ;;  %v709_v21 = vadd.f32 %v708_v14, %v2127_v57 }
 0x1fe   : > { %1536 = vpow.bf16 %v752_v13  ;;  %v711_v63 = vadd.f32 %v710_v15, %v575_v55  ;;  %v712_v20 = vpop.f32.mrb[7].mxu0 }
 0x1ff   : > { %v713_v22 = vadd.f32 %v712_v20, %v2127_v57  ;;  %1538 = vpow.bf16 %v755_v17 }
 0x200   : > { %v2141_v24 = vpack.c.bf16 %v711_v63, %v707_v19 }
 0x201   : > { %v2143_v25 = vpack.c.bf16 %v713_v22, %v709_v21 }
 0x202   : > { %v745_v11 = vmin.bf16 %v1782_v6, %v2141_v24 }
 0x203   : > { %v746_v26 = vmin.bf16 %v1782_v6, %v2143_v25  ;;  %v716_v27 = vpop.f32.mrb[8].mxu0 }
 0x204   : > { %v758_v28 = vmul.bf16 1069105081, %v745_v11  ;;  %v718_v30 = vpop.f32.mrb[9].mxu0  ;;  %v717_v34 = vadd.f32 %v716_v27, %v575_v55 }
 0x205   : > { %v761_v31 = vmul.bf16 1069105081, %v746_v26  ;;  %v720_v33 = vpop.f32.mrb[10].mxu0  ;;  %v719_v36 = vadd.f32 %v718_v30, %v2127_v57 }
 0x206   : > { %1540 = vpow.bf16 %v758_v28  ;;  %v721_v29 = vadd.f32 %v720_v33, %v575_v55  ;;  %v722_v35 = vpop.f32.mrb[11].mxu0 }
 0x207   : > { %1542 = vpow.bf16 %v761_v31  ;;  %v723_v38 = vadd.f32 %v722_v35, %v2127_v57 }
 0x208   : > { %v2151_v39 = vpack.c.bf16 %v721_v29, %v717_v34 }
 0x209   : > { %v1537_v40 = vpop.eup %1536  ;;  %v2153_v41 = vpack.c.bf16 %v723_v38, %v719_v36 }
 0x20a   : > { %v1539_v32 = vpop.eup %1538  ;;  %v747_v23 = vmin.bf16 %v1782_v6, %v2151_v39  ;;  %v775_v37 = vadd.bf16 1073758208, %v1537_v40 }
 0x20b   : > { %v748_v42 = vmin.bf16 %v1782_v6, %v2153_v41  ;;  %v726_v43 = vpop.f32.mrb[12].mxu0  ;;  %v776_v44 = vadd.bf16 1073758208, %v1539_v32 }
 0x20c   : > { %v764_v45 = vmul.bf16 1069105081, %v747_v23  ;;  %v728_v46 = vpop.f32.mrb[13].mxu0  ;;  %v783_v47 = vmul.bf16 %v1537_v40, %v775_v37  ;;  %v727_v53 = vadd.f32 %v726_v43, %v575_v55 }
 0x20d   : > { %v767_v49 = vmul.bf16 1069105081, %v748_v42  ;;  %v730_v50 = vpop.f32.mrb[14].mxu0  ;;  %v784_v51 = vmul.bf16 %v1539_v32, %v776_v44  ;;  %v729_v59 = vadd.f32 %v728_v46, %v2127_v57 }
 0x20e   : > { %1544 = vpow.bf16 %v764_v45  ;;  %v731_v54 = vadd.f32 %v730_v50, %v575_v55  ;;  %v732_v56 = vpop.f32.mrb[15].mxu0  ;;  %v791_v58 = vadd.bf16 1073758208, %v783_v47 }
 0x20f   : > { %1546 = vpow.bf16 %v767_v49  ;;  %v733_v48 = vadd.f32 %v732_v56, %v2127_v57  ;;  %v792_v60 = vadd.bf16 1073758208, %v784_v51 }
 0x210   : > { %v2161_v61 = vpack.c.bf16 %v731_v54, %v727_v53  ;;  %1548 = vrcp.bf16 %v791_v58 }
 0x211   : > { %v1541_v62 = vpop.eup %1540  ;;  %v2163_v2 = vpack.c.bf16 %v733_v48, %v729_v59  ;;  %1550 = vrcp.bf16 %v792_v60 }
 0x212   : > { %v1543_v7 = vpop.eup %1542  ;;  %v749_v10 = vmin.bf16 %v1782_v6, %v2161_v61  ;;  %v777_v55 = vadd.bf16 1073758208, %v1541_v62 }
 0x213   : > { %v750_v12 = vmin.bf16 %v1782_v6, %v2163_v2  ;;  %v778_v13 = vadd.bf16 1073758208, %v1543_v7 }
 0x214   : > { %v770_v14 = vmul.bf16 1069105081, %v749_v10  ;;  %v785_v15 = vmul.bf16 %v1541_v62, %v777_v55 }
 0x215   : > { %v773_v57 = vmul.bf16 1069105081, %v750_v12  ;;  %v786_v17 = vmul.bf16 %v1543_v7, %v778_v13 }
 0x216   : > { %1552 = vpow.bf16 %v770_v14  ;;  %v793_v19 = vadd.bf16 1073758208, %v785_v15 }
 0x217   : > { %1554 = vpow.bf16 %v773_v57  ;;  %v794_v63 = vadd.bf16 1073758208, %v786_v17 }
 0x218   : > { %1556 = vrcp.bf16 %v793_v19 }
 0x219   : > { %v1545_v20 = vpop.eup %1544  ;;  %1558 = vrcp.bf16 %v794_v63 }
 0x21a   : > { %v1547_v21 = vpop.eup %1546  ;;  %v779_v22 = vadd.bf16 1073758208, %v1545_v20 }
 0x21b   : > { %v1549_v11 = vpop.eup %1548  ;;  %v780_v26 = vadd.bf16 1073758208, %v1547_v21 }
 0x21c   : > { %v1551_v27 = vpop.eup %1550  ;;  %v800_v28 = vmul.bf16 %v1549_v11, %v783_v47  ;;  %v787_v30 = vmul.bf16 %v1545_v20, %v779_v22 }
 0x21d   : > { %v802_v6 = vmul.bf16 %v1551_v27, %v784_v51  ;;  %v788_v31 = vmul.bf16 %v1547_v21, %v780_v26 }
 0x21e   : > { %v795_v33 = vadd.bf16 1073758208, %v787_v30  ;;  %v815_v35 = vmul.bf16 %v800_v28, %v2131_v52 }
 0x21f   : > { %v816_v34 = vmul.bf16 %v802_v6, %v2133_v3  ;;  %v796_v29 = vadd.bf16 1073758208, %v788_v31 }
 0x220   : > { %1560 = vrcp.bf16 %v795_v33 }
 0x221   : > { %v1553_v36 = vpop.eup %1552  ;;  %991 = vmatprep.mubr.bf16.mxu1 %v816_v34  ;;  %1562 = vrcp.bf16 %v796_v29 }
 0x222   : > { %v1555_v38 = vpop.eup %1554  ;;  %992 = vmatmul.mubr.bf16.vlgmr.msra.gmra.mrb[0].mxu1 %v815_v35  ;;  %v781_v40 = vadd.bf16 1073758208, %v1553_v36 }
 0x223   : > { %v1557_v32 = vpop.eup %1556  ;;  %v782_v23 = vadd.bf16 1073758208, %v1555_v38 }
 0x224   : > { %v1559_v37 = vpop.eup %1558  ;;  %v804_v42 = vmul.bf16 %v1557_v32, %v785_v15  ;;  %v789_v43 = vmul.bf16 %v1553_v36, %v781_v40 }
 0x225   : > { %v806_v44 = vmul.bf16 %v1559_v37, %v786_v17  ;;  %v790_v45 = vmul.bf16 %v1555_v38, %v782_v23 }
 0x226   : > { %v797_v46 = vadd.bf16 1073758208, %v789_v43  ;;  %v817_v52 = vmul.bf16 %v804_v42, %v2141_v24 }
 0x227   : > { %v818_v3 = vmul.bf16 %v806_v44, %v2143_v25  ;;  %v798_v47 = vadd.bf16 1073758208, %v790_v45 }
 0x228   : > { %1564 = vrcp.bf16 %v797_v46 }
 0x229   : > { %999 = vmatprep.mubr.bf16.mxu1 %v818_v3  ;;  %1566 = vrcp.bf16 %v798_v47 }
 0x22a   : > { %1000 = vmatmul.mubr.bf16.gmra.mrb[4].mxu1 %v817_v52 }
 0x22b   : > { %v1561_v49 = vpop.eup %1560 }
 0x22c   : > { %v1563_v50 = vpop.eup %1562  ;;  %v808_v51 = vmul.bf16 %v1561_v49, %v787_v30 }
 0x22d   : > { %v810_v53 = vmul.bf16 %v1563_v50, %v788_v31 }
 0x22e   : > { %v819_v56 = vmul.bf16 %v808_v51, %v2151_v39 }
 0x22f   : > { %v820_v54 = vmul.bf16 %v810_v53, %v2153_v41  ;;  %v2180_v41 = vld [vmem:[%s2303_s6] ss:$0 sm:$0xff] }
 0x231   : > { %1007 = vmatprep.mubr.bf16.mxu1 %v820_v54 }
 0x232   : > { %1008 = vmatmul.mubr.bf16.gmra.mrb[8].mxu1 %v819_v56 }
 0x233   : > { %v1565_v58 = vpop.eup %1564 }
 0x234   : > { %v1567_v59 = vpop.eup %1566  ;;  %v812_v25 = vmul.bf16 %v1565_v58, %v789_v43 }
 0x235   : > { %v814_v48 = vmul.bf16 %v1567_v59, %v790_v45 }
 0x236   : > { %v821_v60 = vmul.bf16 %v812_v25, %v2161_v61 }
 0x237   : > { %v822_v24 = vmul.bf16 %v814_v48, %v2163_v2 }
 0x239   : > { %1015 = vmatprep.mubr.bf16.mxu1 %v822_v24 }
 0x23a   : > { %1016 = vmatmul.mubr.bf16.gmra.mrb[12].mxu1 %v821_v60 }
 0x2f5   : > { %v1365_v62 = vpop.f32.mrb[0].mxu1 }
 0x2f6   : > { %v1366_v7 = vpop.f32.mrb[1].mxu1 }
 0x2f7   : > { %v1367_v39 = vadd.f32 %v1366_v7, %v1365_v62  ;;  %v1368_v10 = vpop.f32.mrb[2].mxu1 }
 0x2f8   : > { %v1369_v55 = vpop.f32.mrb[3].mxu1 }
 0x2f9   : > { %v1058_v12 = vadd.f32 %v1367_v39, %v2180_v41  ;;  %v1370_v13 = vadd.f32 %v1369_v55, %v1368_v10 }
 0x2fb   : > { %v2184_v14 = vadd.f32 %v1058_v12, %v2029_v0  ;;  %v1059_v61 = vadd.f32 %v1370_v13, %v2180_v41 }
 0x2fd   : > { %v1082_v2 = vmin.f32 %v2184_v14, 20.0  ;;  %v2189_v15 = vadd.f32 %v1059_v61, %v2032_v1  ;;  %v1371_v57 = vpop.f32.mrb[4].mxu1 }
 0x2fe   : > { %v1372_v17 = vpop.f32.mrb[5].mxu1 }
 0x2ff   : > { %v1090_v19 = vmul.f32 1.442695, %v1082_v2  ;;  %v1083_v63 = vmin.f32 %v2189_v15, 20.0  ;;  %v1373_v20 = vadd.f32 %v1372_v17, %v1371_v57  ;;  %v1374_v21 = vpop.f32.mrb[6].mxu1 }
 0x300   : > { %v1375_v22 = vpop.f32.mrb[7].mxu1 }
 0x301   : > { %1568 = vpow2.f32 %v1090_v19  ;;  %v1092_v11 = vmul.f32 1.442695, %v1083_v63  ;;  %v1060_v0 = vadd.f32 %v1373_v20, %v2180_v41  ;;  %v1376_v26 = vadd.f32 %v1375_v22, %v1374_v21 }
 0x303   : > { %1570 = vpow2.f32 %v1092_v11  ;;  %v2194_v27 = vadd.f32 %v1060_v0, %v2040_v4  ;;  %v1061_v1 = vadd.f32 %v1376_v26, %v2180_v41 }
 0x305   : > { %v1084_v28 = vmin.f32 %v2194_v27, 20.0  ;;  %v2199_v30 = vadd.f32 %v1061_v1, %v2044_v5  ;;  %v1377_v6 = vpop.f32.mrb[8].mxu1 }
 0x306   : > { %v1378_v31 = vpop.f32.mrb[9].mxu1 }
 0x307   : > { %v1094_v33 = vmul.f32 1.442695, %v1084_v28  ;;  %v1085_v34 = vmin.f32 %v2199_v30, 20.0  ;;  %v1379_v29 = vadd.f32 %v1378_v31, %v1377_v6  ;;  %v1380_v35 = vpop.f32.mrb[10].mxu1 }
 0x308   : > { %v1381_v36 = vpop.f32.mrb[11].mxu1 }
 0x309   : > { %1572 = vpow2.f32 %v1094_v33  ;;  %v1096_v38 = vmul.f32 1.442695, %v1085_v34  ;;  %v1062_v4 = vadd.f32 %v1379_v29, %v2180_v41  ;;  %v1382_v40 = vadd.f32 %v1381_v36, %v1380_v35 }
 0x30b   : > { %v1569_v32 = vpop.eup %1568  ;;  %1574 = vpow2.f32 %v1096_v38  ;;  %v2204_v23 = vadd.f32 %v1062_v4, %v2053_v8  ;;  %v1063_v5 = vadd.f32 %v1382_v40, %v2180_v41 }
 0x30c   : > { %v1106_v37 = vadd.f32 2.0, %v1569_v32 }
 0x30d   : > { %v1571_v42 = vpop.eup %1570  ;;  %v1086_v43 = vmin.f32 %v2204_v23, 20.0  ;;  %v2209_v44 = vadd.f32 %v1063_v5, %v2056_v9  ;;  %v1383_v45 = vpop.f32.mrb[12].mxu1 }
 0x30e   : > { %v1114_v46 = vmul.f32 %v1569_v32, %v1106_v37  ;;  %v1107_v3 = vadd.f32 2.0, %v1571_v42  ;;  %v1384_v47 = vpop.f32.mrb[13].mxu1 }
 0x30f   : > { %v1098_v52 = vmul.f32 1.442695, %v1086_v43  ;;  %v1087_v49 = vmin.f32 %v2209_v44, 20.0  ;;  %v1385_v50 = vadd.f32 %v1384_v47, %v1383_v45  ;;  %v1386_v51 = vpop.f32.mrb[14].mxu1 }
 0x310   : > { %v1130_v8 = vadd.f32 2.0, %v1114_v46  ;;  %v1115_v53 = vmul.f32 %v1571_v42, %v1107_v3  ;;  %v1387_v54 = vpop.f32.mrb[15].mxu1  ;;  %v1122_v17 = vmul.f32 %v1114_v46, %v2184_v14 }
 0x311   : > { %1576 = vpow2.f32 %v1098_v52  ;;  %v1100_v56 = vmul.f32 1.442695, %v1087_v49  ;;  %v1064_v58 = vadd.f32 %v1385_v50, %v2180_v41  ;;  %v1388_v59 = vadd.f32 %v1387_v54, %v1386_v51 }
 0x312   : > { %1578 = vrcp.f32 %v1130_v8  ;;  %v1131_v9 = vadd.f32 2.0, %v1115_v53  ;;  %v1123_v21 = vmul.f32 %v1115_v53, %v2189_v15 }
 0x313   : > { %v1573_v25 = vpop.eup %1572  ;;  %1580 = vpow2.f32 %v1100_v56  ;;  %v2214_v48 = vadd.f32 %v1064_v58, %v2065_v16  ;;  %v1065_v24 = vadd.f32 %v1388_v59, %v2180_v41 }
 0x314   : > { %1582 = vrcp.f32 %v1131_v9  ;;  %v1108_v60 = vadd.f32 2.0, %v1573_v25 }
 0x315   : > { %v1575_v62 = vpop.eup %1574  ;;  %v1088_v7 = vmin.f32 %v2214_v48, 20.0  ;;  %v2219_v39 = vadd.f32 %v1065_v24, %v2068_v18 }
 0x316   : > { %v1116_v10 = vmul.f32 %v1573_v25, %v1108_v60  ;;  %v1109_v55 = vadd.f32 2.0, %v1575_v62 }
 0x317   : > { %v1102_v12 = vmul.f32 1.442695, %v1088_v7  ;;  %v1089_v13 = vmin.f32 %v2219_v39, 20.0 }
 0x318   : > { %v1132_v61 = vadd.f32 2.0, %v1116_v10  ;;  %v1117_v2 = vmul.f32 %v1575_v62, %v1109_v55  ;;  %v1124_v15 = vmul.f32 %v1116_v10, %v2194_v27 }
 0x319   : > { %1584 = vpow2.f32 %v1102_v12  ;;  %v1104_v16 = vmul.f32 1.442695, %v1089_v13 }
 0x31a   : > { %1586 = vrcp.f32 %v1132_v61  ;;  %v1133_v41 = vadd.f32 2.0, %v1117_v2  ;;  %v1125_v35 = vmul.f32 %v1117_v2, %v2199_v30 }
 0x31b   : > { %v1577_v57 = vpop.eup %1576  ;;  %1588 = vpow2.f32 %v1104_v16 }
 0x31c   : > { %v1579_v19 = vpop.eup %1578  ;;  %1590 = vrcp.f32 %v1133_v41  ;;  %v1110_v18 = vadd.f32 2.0, %v1577_v57 }
 0x31d   : > { %v1581_v63 = vpop.eup %1580  ;;  %v1146_v20 = vmul.f32 %v1579_v19, %v1122_v17 }
 0x31e   : > { %v1583_v22 = vpop.eup %1582  ;;  %v1118_v11 = vmul.f32 %v1577_v57, %v1110_v18  ;;  %v1111_v0 = vadd.f32 2.0, %v1581_v63 }
 0x31f   : > { %1154 = vst [vmem:[%s2226_s14] sm:$0xff] %v1146_v20  ;;  %v1147_v26 = vmul.f32 %v1583_v22, %v1123_v21 }
 0x320   : > { %v1134_v1 = vadd.f32 2.0, %v1118_v11  ;;  %v1119_v14 = vmul.f32 %v1581_v63, %v1111_v0  ;;  %v1126_v37 = vmul.f32 %v1118_v11, %v2204_v23 }
 0x321   : > { %1155 = vst [vmem:[%s2226_s14 + $0x8] sm:$0xff] %v1147_v26 }
 0x322   : > { %1592 = vrcp.f32 %v1134_v1  ;;  %v1135_v28 = vadd.f32 2.0, %v1119_v14  ;;  %v1127_v43 = vmul.f32 %v1119_v14, %v2209_v44 }
 0x323   : > { %v1585_v6 = vpop.eup %1584 }
 0x324   : > { %v1587_v31 = vpop.eup %1586  ;;  %1594 = vrcp.f32 %v1135_v28  ;;  %v1112_v33 = vadd.f32 2.0, %v1585_v6 }
 0x325   : > { %v1589_v34 = vpop.eup %1588  ;;  %v1148_v29 = vmul.f32 %v1587_v31, %v1124_v15 }
 0x326   : > { %v1591_v36 = vpop.eup %1590  ;;  %v1120_v38 = vmul.f32 %v1585_v6, %v1112_v33  ;;  %v1113_v4 = vadd.f32 2.0, %v1589_v34 }
 0x327   : > { %1156 = vst [vmem:[%s2226_s14 + $0x10] sm:$0xff] %v1148_v29  ;;  %v1149_v40 = vmul.f32 %v1591_v36, %v1125_v35 }
 0x328   : > { %v1136_v32 = vadd.f32 2.0, %v1120_v38  ;;  %v1121_v5 = vmul.f32 %v1589_v34, %v1113_v4  ;;  %v1128_v3 = vmul.f32 %v1120_v38, %v2214_v48 }
 0x329   : > { %1157 = vst [vmem:[%s2226_s14 + $0x18] sm:$0xff] %v1149_v40 }
 0x32a   : > { %1596 = vrcp.f32 %v1136_v32  ;;  %v1137_v27 = vadd.f32 2.0, %v1121_v5  ;;  %v1129_v23 = vmul.f32 %v1121_v5, %v2219_v39 }
 0x32c   : > { %v1593_v42 = vpop.eup %1592  ;;  %1598 = vrcp.f32 %v1137_v27 }
 0x32d   : > { %v1150_v30 = vmul.f32 %v1593_v42, %v1126_v37 }
 0x32e   : > { %v1595_v45 = vpop.eup %1594 }
 0x32f   : > { %1158 = vst [vmem:[%s2226_s14 + $0x20] sm:$0xff] %v1150_v30  ;;  %v1151_v46 = vmul.f32 %v1595_v45, %v1127_v43 }
 0x331   : > { %1159 = vst [vmem:[%s2226_s14 + $0x28] sm:$0xff] %v1151_v46 }
 0x334   : > { %v1597_v47 = vpop.eup %1596 }
 0x335   : > { %v1152_v52 = vmul.f32 %v1597_v47, %v1128_v3 }
 0x336   : > { %v1599_v49 = vpop.eup %1598 }
 0x337   : > { %1160 = vst [vmem:[%s2226_s14 + $0x30] sm:$0xff] %v1152_v52  ;;  %v1153_v44 = vmul.f32 %v1599_v49, %v1129_v23 }
 0x339   : > { %1161 = vst [vmem:[%s2226_s14 + $0x38] sm:$0xff] %v1153_v44 }
 0x33a   : > { %1699 = shalt.err (!%p1696_p5)
}
 0x33b   : > { %s1700_s20 = scalar_lea.hbm %s2245_s17, 1024  ;;  %s1704_s18 = scalar_lea.hbm %s2304_s7, 4096 }
 0x33c   : > { %p1701_p9 = scmp.ne.s32.totalorder %s2245_s17, %s1700_s20  ;;  %p1705_p3 = scmp.lt.u32.totalorder %s2245_s17, %s2304_s7 }
 0x33d   : > { %p1706_p7 = scmp.lt.u32.totalorder %s1704_s18, %s1700_s20  ;;  %p1708_p2 = scmp.lt.u32.totalorder %s1700_s20, %s2245_s17 }
 0x33e   : > { %p1702_p12 = pnand %p1701_p9, %p1954_p11 }
 0x33f   : > { %p1707_p10 = por %p1706_p7, %p1705_p3 }
 0x340   : > { %p1703_p1 = pneg %p1702_p12 }
 0x341   : > { %p1709_p4 = por %p1708_p2, %p1707_p10 }
 0x343   : > { %p1710_p6 = pnand %p1709_p4, %p1703_p1 }
 0x345   : > { %1713 = shalt.err (!%p1710_p6)
}
 0x346   : > { %s1784_s10 = smov 128   ;;  %s1785_s8 = smov 8  }
 0x347   : > { %1399 = dma.vmem_to_hbm [thread:$0]  (%p1954_p11), %s2247_s16, 1024, %s2245_s17, %s1163_s27, %s1784_s10, %s1784_s10, %s1785_s8  }
 0x348 PF: > { %s2327_s9 = sld [smem:[#allocation14_spill]]  ;;  %s2328_s11 = sld [smem:[#allocation15_spill]] }
 0x349   : > { %p1421_p8 = scmp.ge.s32.totalorder %s1772_s29, 2 }
 0x34e   : > { %s1191_s13 = sand.u32 1, %s2327_s9   ;;  %p2329_p13 = scmp.ne.s32.totalorder %s2328_s11, 0 }
 0x34f   : > { %s1192_s19 = scalar_lea.sflag [#allocation6], %s1191_s13 }
 0x350   : > { %p1413_p0 = pnand %p1421_p8, %p2329_p13 }
 0x352   : > { %1747 = dma.done.wait (!%p1413_p0), %s1192_s19, 1024  }
 0x353   : > { %1749 = vsyncadd (!%p1413_p0), %s1192_s19, 4294966272  ;;  %s24_s29 = sadd.s32 1, %s1772_s29   ;;  %s2330_s24 = smov %s1756_s25 }
 0x354   : > { %p21_p5 = scmp.ge.s32.totalorder %s24_s29, 6   ;;  %s2331_s25 = smov %s1760_s26 }
 0x355   : > { %s2332_s26 = smov %s1963_s15  ;;  %s2333_s27 = smov %s1768_s28 }
 0x356   : > { %s2334_s28 = smov %s2336_s22  ;;  %23 = sbr.rel (!%p21_p5) target bundleno = 7 (0x7), region = 114 }
 0x35d   :  { %1197 = vsyncpa [#allocation5], 1 }
 0x35e   :  { %1199 = vsyncpa [#allocation5 + $0x1], 1 }
 0x35f   :  { %1200 = vsyncpa [#allocation8], 1 }
 0x360   :  { %1201 = vsyncpa [#allocation6], 1 }
 0x361   :  { %1203 = vsyncpa [#allocation6 + $0x1], 1 }

</bundles_post_ra>
